<compile_context>
chip_gen: v5e
topology: v5e:2x2
jax: 0.10.0
libtpu: 0.0.40
codegen_flags: <defaults>
</compile_context>

<pallas_src>
import functools

import numpy as np
import jax
import jax.numpy as jnp
from jax.experimental import pallas as pl
from jax.experimental.pallas import tpu as pltpu  # noqa: F401  (kept for TPU-specific tuning hooks)


# layer table: (name, C_in, C_out, K, stride, padding, transposed, relu)
_LAYERS = (
    ("e1", 1, 16, 3, 2, 1, False, True),
    ("e2", 16, 32, 3, 2, 1, False, True),
    ("e3", 32, 64, 3, 2, 1, False, True),
    ("d1", 64, 32, 4, 2, 1, True, True),
    ("d2", 32, 16, 4, 2, 1, True, True),
    ("d3", 16, 1, 4, 2, 1, True, False),
)


def _out_len(L, K, s, p, transposed):
    return (L - 1) * s - 2 * p + K if transposed else (L + 2 * p - K) // s + 1


def _gather_matrices(L_in, L_out, K, stride, padding, transposed, N):
    """Constant 0/1 matrices G[k] of shape (N*L_in, N*L_out), block-diagonal over batch.

    Conv:        (X @ G[k])[c, n*L_out + o] = x[n, c, stride*o + k - padding]
    ConvTransp.: (X @ G[k])[c, n*L_out + j] = x[n, c, i]  where j = stride*i + k - padding
    Out-of-range taps are simply not selected (implements zero padding / cropping).
    """
    g = np.zeros((K, N * L_in, N * L_out), np.float32)
    for k in range(K):
        for n in range(N):
            if transposed:
                for i in range(L_in):
                    j = stride * i + k - padding
                    if 0 <= j < L_out:
                        g[k, n * L_in + i, n * L_out + j] = 1.0
            else:
                for o in range(L_out):
                    i = stride * o + k - padding
                    if 0 <= i < L_in:
                        g[k, n * L_in + i, n * L_out + o] = 1.0
    return jnp.asarray(g)


# ----------------------------------------------------------------------------
# Fused Pallas kernel: the full autoencoder forward, everything VMEM-resident.
#   refs = (x_ref, [w_ref, b_ref, g_ref] * 6, o_ref)
#     x_ref : (1, N*L)                 input, batch folded into lanes
#     w_ref : (K, C_out, C_in)         per-tap weight matrices
#     b_ref : (C_out, 1)               bias
#     g_ref : (K, N*L_in, N*L_out)     constant 0/1 gather matrices
#     o_ref : (1, N*L)                 lane-dense output
# ----------------------------------------------------------------------------
def _fused_autoencoder_kernel(*refs, layer_defs):
    x_ref, o_ref = refs[0], refs[-1]
    layer_refs = refs[1:-1]

    h = x_ref[...]                                        # (C_in, N*L) f32
    for li, (K, relu) in enumerate(layer_defs):
        w_ref, b_ref, g_ref = layer_refs[3 * li:3 * li + 3]
        y = None
        for k in range(K):                                # static unrolled, K <= 4
            t = jnp.dot(h, g_ref[k], preferred_element_type=jnp.float32)   # (C_in, N*L_out)
            w_k = w_ref[k]                                                  # (C_out, C_in)
            if w_k.shape[1] == 1:
                # C_in == 1: rank-1 outer product via VPU broadcast (avoids a
                # degenerate contraction-dim-1 matmul).
                t = w_k * t
            else:
                t = jnp.dot(w_k, t, preferred_element_type=jnp.float32)     # (C_out, N*L_out)
            y = t if y is None else y + t
        y = y + b_ref[...]                                # bias broadcast over lanes
        if relu:
            y = jnp.maximum(y, 0.0)
        h = y
    o_ref[...] = h.astype(o_ref.dtype)


# ----------------------------------------------------------------------------
# Wrapper: one pallas_call for the whole forward pass.
# ----------------------------------------------------------------------------
def conv_autoencoder_forward(params, x):
    N, C, L = x.shape
    assert C == 1

    # present the input lane-dense: (N, 1, L) -> (1, N*L)
    inputs = [x.astype(jnp.float32).reshape(1, N * L)]
    layer_defs = []
    l = L
    for name, c_in, c_out, K, s, p, transposed, relu in _LAYERS:
        l_out = _out_len(l, K, s, p, transposed)
        w = params[name + "_w"]
        # per-tap weights arranged (K, C_out, C_in) — PyTorch Conv1d weights are
        # (C_out, C_in, K); ConvTranspose1d weights are (C_in, C_out, K).
        w_k = w.transpose(2, 1, 0) if transposed else w.transpose(2, 0, 1)
        b = params[name + "_b"].reshape(c_out, 1)
        g = _gather_matrices(l, l_out, K, s, p, transposed, N)
        inputs += [w_k, b, g]
        layer_defs.append((K, relu))
        l = l_out

    out2d = pl.pallas_call(
        functools.partial(_fused_autoencoder_kernel, layer_defs=tuple(layer_defs)),
        out_shape=jax.ShapeDtypeStruct((1, N * l), jnp.float32),
        # no grid: single invocation, all operands as whole-array VMEM blocks
    )(*inputs)

    d = out2d.reshape(N, 1, l)
    if l != L:
        # TODO(synk): F.interpolate(mode='linear', align_corners=False) approximated
        # with jax.image.resize triangle kernel (half-pixel centers); plain-JAX fallback,
        # only triggers when L is not a multiple of 8.
        d = jax.image.resize(d, (N, 1, L), method="linear", antialias=False)
    return d.astype(x.dtype)


# ----------------------------------------------------------------------------
# Parameters (deterministic, PyTorch-like uniform(-1/sqrt(fan_in), +...) init)
# ----------------------------------------------------------------------------
def _init_params(key):
    def uni(key, shape, fan_in):
        bound = 1.0 / jnp.sqrt(jnp.float32(fan_in))
        return jax.random.uniform(key, shape, jnp.float32, -bound, bound)

    keys = jax.random.split(key, 12)
    p = {}
    # encoder: Conv1d weights (C_out, C_in, K)
    p["e1_w"] = uni(keys[0], (16, 1, 3), 1 * 3)
    p["e1_b"] = uni(keys[1], (16,), 1 * 3)
    p["e2_w"] = uni(keys[2], (32, 16, 3), 16 * 3)
    p["e2_b"] = uni(keys[3], (32,), 16 * 3)
    p["e3_w"] = uni(keys[4], (64, 32, 3), 32 * 3)
    p["e3_b"] = uni(keys[5], (64,), 32 * 3)
    # decoder: ConvTranspose1d weights (C_in, C_out, K)
    p["d1_w"] = uni(keys[6], (64, 32, 4), 32 * 4)
    p["d1_b"] = uni(keys[7], (32,), 32 * 4)
    p["d2_w"] = uni(keys[8], (32, 16, 4), 16 * 4)
    p["d2_b"] = uni(keys[9], (16,), 16 * 4)
    p["d3_w"] = uni(keys[10], (16, 1, 4), 1 * 4)
    p["d3_b"] = uni(keys[11], (1,), 1 * 4)
    return p


# ----------------------------------------------------------------------------
# Independent pure-lax reference (for numerical self-check)
# ----------------------------------------------------------------------------
def _reference_forward(params, x):
    dn = ("NCH", "OIH", "NCH")
    prec = jax.lax.Precision.HIGHEST

    def conv(h, w, b, s, p):
        y = jax.lax.conv_general_dilated(h, w, (s,), [(p, p)],
                                         dimension_numbers=dn, precision=prec)
        return y + b.reshape(1, -1, 1)

    def convT(h, w_t, b, s, p):
        K = w_t.shape[-1]
        w_conv = jnp.flip(w_t, -1).transpose(1, 0, 2)
        y = jax.lax.conv_general_dilated(h, w_conv, (1,), [(K - 1 - p, K - 1 - p)],
                                         lhs_dilation=(s,), dimension_numbers=dn,
                                         precision=prec)
        return y + b.reshape(1, -1, 1)

    h = jax.nn.relu(conv(x, params["e1_w"], params["e1_b"], 2, 1))
    h = jax.nn.relu(conv(h, params["e2_w"], params["e2_b"], 2, 1))
    h = jax.nn.relu(conv(h, params["e3_w"], params["e3_b"], 2, 1))
    d = jax.nn.relu(convT(h, params["d1_w"], params["d1_b"], 2, 1))
    d = jax.nn.relu(convT(d, params["d2_w"], params["d2_b"], 2, 1))
    d = convT(d, params["d3_w"], params["d3_b"], 2, 1)
    if d.shape[-1] != x.shape[-1]:
        d = jax.image.resize(d, x.shape, method="linear", antialias=False)
    return d


if __name__ == "__main__":
    key = jax.random.PRNGKey(0)
    pkey, xkey = jax.random.split(key)
    params = _init_params(pkey)

    N, C, L = 2, 1, 64  # (batch=2, channels=1, length=64)
    x = jax.random.normal(xkey, (N, C, L), jnp.float32)

    fwd = jax.jit(conv_autoencoder_forward)
    out = jax.block_until_ready(fwd(params, x))
    assert out.shape == (N, 1, L), out.shape

    ref = jax.block_until_ready(_reference_forward(params, x))
    max_err = float(jnp.max(jnp.abs(out - ref)))
    assert max_err < 2e-3, f"max abs err vs lax reference: {max_err}"

    print("KERNEL_OK")
</pallas_src>

<mosaic_0001>
module attributes {stable_mosaic.version = 11 : i64} {
  func.func @_fused_autoencoder_kernel(%arg0: memref<1x128xf32, #tpu.memory_space<vmem>>, %arg1: memref<3x16x1xf32, #tpu.memory_space<vmem>>, %arg2: memref<16x1xf32, #tpu.memory_space<vmem>>, %arg3: memref<3x128x64xf32, #tpu.memory_space<vmem>>, %arg4: memref<3x32x16xf32, #tpu.memory_space<vmem>>, %arg5: memref<32x1xf32, #tpu.memory_space<vmem>>, %arg6: memref<3x64x32xf32, #tpu.memory_space<vmem>>, %arg7: memref<3x64x32xf32, #tpu.memory_space<vmem>>, %arg8: memref<64x1xf32, #tpu.memory_space<vmem>>, %arg9: memref<3x32x16xf32, #tpu.memory_space<vmem>>, %arg10: memref<4x32x64xf32, #tpu.memory_space<vmem>>, %arg11: memref<32x1xf32, #tpu.memory_space<vmem>>, %arg12: memref<4x16x32xf32, #tpu.memory_space<vmem>>, %arg13: memref<4x16x32xf32, #tpu.memory_space<vmem>>, %arg14: memref<16x1xf32, #tpu.memory_space<vmem>>, %arg15: memref<4x32x64xf32, #tpu.memory_space<vmem>>, %arg16: memref<4x1x16xf32, #tpu.memory_space<vmem>>, %arg17: memref<1x1xf32, #tpu.memory_space<vmem>>, %arg18: memref<4x64x128xf32, #tpu.memory_space<vmem>>, %arg19: memref<1x128xf32, #tpu.memory_space<vmem>>) attributes {dimension_semantics = [], scalar_prefetch = 0 : i64, scratch_operands = 0 : i64, tpu.core_type = #tpu.core_type<tc>} {
    %c0 = arith.constant 0 : index
    %c0_0 = arith.constant 0 : index
    %0 = vector.load %arg0[%c0, %c0_0] : memref<1x128xf32, #tpu.memory_space<vmem>>, vector<1x128xf32>
    %c0_1 = arith.constant 0 : index
    %c0_2 = arith.constant 0 : index
    %c0_3 = arith.constant 0 : index
    %1 = vector.load %arg3[%c0_1, %c0_2, %c0_3] : memref<3x128x64xf32, #tpu.memory_space<vmem>>, vector<1x128x64xf32>
    %2 = vector.shape_cast %1 : vector<1x128x64xf32> to vector<128x64xf32>
    %cst = arith.constant dense<0.000000e+00> : vector<1x64xf32>
    %3 = tpu.matmul %0, %2, %cst {dimension_numbers = #tpu.dot_dimension_numbers<[1], [0], [0], [1], [0, 0, 1, 1], [], []>} : vector<1x128xf32>, vector<128x64xf32>, vector<1x64xf32> -> vector<1x64xf32>
    %c0_4 = arith.constant 0 : index
    %c0_5 = arith.constant 0 : index
    %c0_6 = arith.constant 0 : index
    %4 = vector.load %arg1[%c0_4, %c0_5, %c0_6] : memref<3x16x1xf32, #tpu.memory_space<vmem>>, vector<1x16x1xf32>
    %5 = vector.shape_cast %4 : vector<1x16x1xf32> to vector<16x1xf32>
    %6 = vector.broadcast %5 : vector<16x1xf32> to vector<16x64xf32>
    %7 = vector.broadcast %3 : vector<1x64xf32> to vector<16x64xf32>
    %8 = arith.mulf %6, %7 : vector<16x64xf32>
    %c1 = arith.constant 1 : index
    %c0_7 = arith.constant 0 : index
    %c0_8 = arith.constant 0 : index
    %9 = vector.load %arg3[%c1, %c0_7, %c0_8] : memref<3x128x64xf32, #tpu.memory_space<vmem>>, vector<1x128x64xf32>
    %10 = vector.shape_cast %9 : vector<1x128x64xf32> to vector<128x64xf32>
    %cst_9 = arith.constant dense<0.000000e+00> : vector<1x64xf32>
    %11 = tpu.matmul %0, %10, %cst_9 {dimension_numbers = #tpu.dot_dimension_numbers<[1], [0], [0], [1], [0, 0, 1, 1], [], []>} : vector<1x128xf32>, vector<128x64xf32>, vector<1x64xf32> -> vector<1x64xf32>
    %c1_10 = arith.constant 1 : index
    %c0_11 = arith.constant 0 : index
    %c0_12 = arith.constant 0 : index
    %12 = vector.load %arg1[%c1_10, %c0_11, %c0_12] : memref<3x16x1xf32, #tpu.memory_space<vmem>>, vector<1x16x1xf32>
    %13 = vector.shape_cast %12 : vector<1x16x1xf32> to vector<16x1xf32>
    %14 = vector.broadcast %13 : vector<16x1xf32> to vector<16x64xf32>
    %15 = vector.broadcast %11 : vector<1x64xf32> to vector<16x64xf32>
    %16 = arith.mulf %14, %15 : vector<16x64xf32>
    %17 = arith.addf %8, %16 : vector<16x64xf32>
    %c2 = arith.constant 2 : index
    %c0_13 = arith.constant 0 : index
    %c0_14 = arith.constant 0 : index
    %18 = vector.load %arg3[%c2, %c0_13, %c0_14] : memref<3x128x64xf32, #tpu.memory_space<vmem>>, vector<1x128x64xf32>
    %19 = vector.shape_cast %18 : vector<1x128x64xf32> to vector<128x64xf32>
    %cst_15 = arith.constant dense<0.000000e+00> : vector<1x64xf32>
    %20 = tpu.matmul %0, %19, %cst_15 {dimension_numbers = #tpu.dot_dimension_numbers<[1], [0], [0], [1], [0, 0, 1, 1], [], []>} : vector<1x128xf32>, vector<128x64xf32>, vector<1x64xf32> -> vector<1x64xf32>
    %c2_16 = arith.constant 2 : index
    %c0_17 = arith.constant 0 : index
    %c0_18 = arith.constant 0 : index
    %21 = vector.load %arg1[%c2_16, %c0_17, %c0_18] : memref<3x16x1xf32, #tpu.memory_space<vmem>>, vector<1x16x1xf32>
    %22 = vector.shape_cast %21 : vector<1x16x1xf32> to vector<16x1xf32>
    %23 = vector.broadcast %22 : vector<16x1xf32> to vector<16x64xf32>
    %24 = vector.broadcast %20 : vector<1x64xf32> to vector<16x64xf32>
    %25 = arith.mulf %23, %24 : vector<16x64xf32>
    %26 = arith.addf %17, %25 : vector<16x64xf32>
    %c0_19 = arith.constant 0 : index
    %c0_20 = arith.constant 0 : index
    %27 = vector.load %arg2[%c0_19, %c0_20] : memref<16x1xf32, #tpu.memory_space<vmem>>, vector<16x1xf32>
    %28 = vector.broadcast %27 : vector<16x1xf32> to vector<16x64xf32>
    %29 = arith.addf %26, %28 : vector<16x64xf32>
    %cst_21 = arith.constant 0.000000e+00 : f32
    %30 = vector.broadcast %cst_21 : f32 to vector<16x64xf32>
    %31 = arith.maximumf %29, %30 : vector<16x64xf32>
    %c0_22 = arith.constant 0 : index
    %c0_23 = arith.constant 0 : index
    %c0_24 = arith.constant 0 : index
    %32 = vector.load %arg6[%c0_22, %c0_23, %c0_24] : memref<3x64x32xf32, #tpu.memory_space<vmem>>, vector<1x64x32xf32>
    %33 = vector.shape_cast %32 : vector<1x64x32xf32> to vector<64x32xf32>
    %cst_25 = arith.constant dense<0.000000e+00> : vector<16x32xf32>
    %34 = tpu.matmul %31, %33, %cst_25 {dimension_numbers = #tpu.dot_dimension_numbers<[1], [0], [0], [1], [0, 0, 1, 1], [], []>} : vector<16x64xf32>, vector<64x32xf32>, vector<16x32xf32> -> vector<16x32xf32>
    %c0_26 = arith.constant 0 : index
    %c0_27 = arith.constant 0 : index
    %c0_28 = arith.constant 0 : index
    %35 = vector.load %arg4[%c0_26, %c0_27, %c0_28] : memref<3x32x16xf32, #tpu.memory_space<vmem>>, vector<1x32x16xf32>
    %36 = vector.shape_cast %35 : vector<1x32x16xf32> to vector<32x16xf32>
    %cst_29 = arith.constant dense<0.000000e+00> : vector<32x32xf32>
    %37 = tpu.matmul %36, %34, %cst_29 {dimension_numbers = #tpu.dot_dimension_numbers<[1], [0], [0], [1], [0, 0, 1, 1], [], []>} : vector<32x16xf32>, vector<16x32xf32>, vector<32x32xf32> -> vector<32x32xf32>
    %c1_30 = arith.constant 1 : index
    %c0_31 = arith.constant 0 : index
    %c0_32 = arith.constant 0 : index
    %38 = vector.load %arg6[%c1_30, %c0_31, %c0_32] : memref<3x64x32xf32, #tpu.memory_space<vmem>>, vector<1x64x32xf32>
    %39 = vector.shape_cast %38 : vector<1x64x32xf32> to vector<64x32xf32>
    %cst_33 = arith.constant dense<0.000000e+00> : vector<16x32xf32>
    %40 = tpu.matmul %31, %39, %cst_33 {dimension_numbers = #tpu.dot_dimension_numbers<[1], [0], [0], [1], [0, 0, 1, 1], [], []>} : vector<16x64xf32>, vector<64x32xf32>, vector<16x32xf32> -> vector<16x32xf32>
    %c1_34 = arith.constant 1 : index
    %c0_35 = arith.constant 0 : index
    %c0_36 = arith.constant 0 : index
    %41 = vector.load %arg4[%c1_34, %c0_35, %c0_36] : memref<3x32x16xf32, #tpu.memory_space<vmem>>, vector<1x32x16xf32>
    %42 = vector.shape_cast %41 : vector<1x32x16xf32> to vector<32x16xf32>
    %cst_37 = arith.constant dense<0.000000e+00> : vector<32x32xf32>
    %43 = tpu.matmul %42, %40, %cst_37 {dimension_numbers = #tpu.dot_dimension_numbers<[1], [0], [0], [1], [0, 0, 1, 1], [], []>} : vector<32x16xf32>, vector<16x32xf32>, vector<32x32xf32> -> vector<32x32xf32>
    %44 = arith.addf %37, %43 : vector<32x32xf32>
    %c2_38 = arith.constant 2 : index
    %c0_39 = arith.constant 0 : index
    %c0_40 = arith.constant 0 : index
    %45 = vector.load %arg6[%c2_38, %c0_39, %c0_40] : memref<3x64x32xf32, #tpu.memory_space<vmem>>, vector<1x64x32xf32>
    %46 = vector.shape_cast %45 : vector<1x64x32xf32> to vector<64x32xf32>
    %cst_41 = arith.constant dense<0.000000e+00> : vector<16x32xf32>
    %47 = tpu.matmul %31, %46, %cst_41 {dimension_numbers = #tpu.dot_dimension_numbers<[1], [0], [0], [1], [0, 0, 1, 1], [], []>} : vector<16x64xf32>, vector<64x32xf32>, vector<16x32xf32> -> vector<16x32xf32>
    %c2_42 = arith.constant 2 : index
    %c0_43 = arith.constant 0 : index
    %c0_44 = arith.constant 0 : index
    %48 = vector.load %arg4[%c2_42, %c0_43, %c0_44] : memref<3x32x16xf32, #tpu.memory_space<vmem>>, vector<1x32x16xf32>
    %49 = vector.shape_cast %48 : vector<1x32x16xf32> to vector<32x16xf32>
    %cst_45 = arith.constant dense<0.000000e+00> : vector<32x32xf32>
    %50 = tpu.matmul %49, %47, %cst_45 {dimension_numbers = #tpu.dot_dimension_numbers<[1], [0], [0], [1], [0, 0, 1, 1], [], []>} : vector<32x16xf32>, vector<16x32xf32>, vector<32x32xf32> -> vector<32x32xf32>
    %51 = arith.addf %44, %50 : vector<32x32xf32>
    %c0_46 = arith.constant 0 : index
    %c0_47 = arith.constant 0 : index
    %52 = vector.load %arg5[%c0_46, %c0_47] : memref<32x1xf32, #tpu.memory_space<vmem>>, vector<32x1xf32>
    %53 = vector.broadcast %52 : vector<32x1xf32> to vector<32x32xf32>
    %54 = arith.addf %51, %53 : vector<32x32xf32>
    %cst_48 = arith.constant 0.000000e+00 : f32
    %55 = vector.broadcast %cst_48 : f32 to vector<32x32xf32>
    %56 = arith.maximumf %54, %55 : vector<32x32xf32>
    %c0_49 = arith.constant 0 : index
    %c0_50 = arith.constant 0 : index
    %c0_51 = arith.constant 0 : index
    %57 = vector.load %arg9[%c0_49, %c0_50, %c0_51] : memref<3x32x16xf32, #tpu.memory_space<vmem>>, vector<1x32x16xf32>
    %58 = vector.shape_cast %57 : vector<1x32x16xf32> to vector<32x16xf32>
    %cst_52 = arith.constant dense<0.000000e+00> : vector<32x16xf32>
    %59 = tpu.matmul %56, %58, %cst_52 {dimension_numbers = #tpu.dot_dimension_numbers<[1], [0], [0], [1], [0, 0, 1, 1], [], []>} : vector<32x32xf32>, vector<32x16xf32>, vector<32x16xf32> -> vector<32x16xf32>
    %c0_53 = arith.constant 0 : index
    %c0_54 = arith.constant 0 : index
    %c0_55 = arith.constant 0 : index
    %60 = vector.load %arg7[%c0_53, %c0_54, %c0_55] : memref<3x64x32xf32, #tpu.memory_space<vmem>>, vector<1x64x32xf32>
    %61 = vector.shape_cast %60 : vector<1x64x32xf32> to vector<64x32xf32>
    %cst_56 = arith.constant dense<0.000000e+00> : vector<64x16xf32>
    %62 = tpu.matmul %61, %59, %cst_56 {dimension_numbers = #tpu.dot_dimension_numbers<[1], [0], [0], [1], [0, 0, 1, 1], [], []>} : vector<64x32xf32>, vector<32x16xf32>, vector<64x16xf32> -> vector<64x16xf32>
    %c1_57 = arith.constant 1 : index
    %c0_58 = arith.constant 0 : index
    %c0_59 = arith.constant 0 : index
    %63 = vector.load %arg9[%c1_57, %c0_58, %c0_59] : memref<3x32x16xf32, #tpu.memory_space<vmem>>, vector<1x32x16xf32>
    %64 = vector.shape_cast %63 : vector<1x32x16xf32> to vector<32x16xf32>
    %cst_60 = arith.constant dense<0.000000e+00> : vector<32x16xf32>
    %65 = tpu.matmul %56, %64, %cst_60 {dimension_numbers = #tpu.dot_dimension_numbers<[1], [0], [0], [1], [0, 0, 1, 1], [], []>} : vector<32x32xf32>, vector<32x16xf32>, vector<32x16xf32> -> vector<32x16xf32>
    %c1_61 = arith.constant 1 : index
    %c0_62 = arith.constant 0 : index
    %c0_63 = arith.constant 0 : index
    %66 = vector.load %arg7[%c1_61, %c0_62, %c0_63] : memref<3x64x32xf32, #tpu.memory_space<vmem>>, vector<1x64x32xf32>
    %67 = vector.shape_cast %66 : vector<1x64x32xf32> to vector<64x32xf32>
    %cst_64 = arith.constant dense<0.000000e+00> : vector<64x16xf32>
    %68 = tpu.matmul %67, %65, %cst_64 {dimension_numbers = #tpu.dot_dimension_numbers<[1], [0], [0], [1], [0, 0, 1, 1], [], []>} : vector<64x32xf32>, vector<32x16xf32>, vector<64x16xf32> -> vector<64x16xf32>
    %69 = arith.addf %62, %68 : vector<64x16xf32>
    %c2_65 = arith.constant 2 : index
    %c0_66 = arith.constant 0 : index
    %c0_67 = arith.constant 0 : index
    %70 = vector.load %arg9[%c2_65, %c0_66, %c0_67] : memref<3x32x16xf32, #tpu.memory_space<vmem>>, vector<1x32x16xf32>
    %71 = vector.shape_cast %70 : vector<1x32x16xf32> to vector<32x16xf32>
    %cst_68 = arith.constant dense<0.000000e+00> : vector<32x16xf32>
    %72 = tpu.matmul %56, %71, %cst_68 {dimension_numbers = #tpu.dot_dimension_numbers<[1], [0], [0], [1], [0, 0, 1, 1], [], []>} : vector<32x32xf32>, vector<32x16xf32>, vector<32x16xf32> -> vector<32x16xf32>
    %c2_69 = arith.constant 2 : index
    %c0_70 = arith.constant 0 : index
    %c0_71 = arith.constant 0 : index
    %73 = vector.load %arg7[%c2_69, %c0_70, %c0_71] : memref<3x64x32xf32, #tpu.memory_space<vmem>>, vector<1x64x32xf32>
    %74 = vector.shape_cast %73 : vector<1x64x32xf32> to vector<64x32xf32>
    %cst_72 = arith.constant dense<0.000000e+00> : vector<64x16xf32>
    %75 = tpu.matmul %74, %72, %cst_72 {dimension_numbers = #tpu.dot_dimension_numbers<[1], [0], [0], [1], [0, 0, 1, 1], [], []>} : vector<64x32xf32>, vector<32x16xf32>, vector<64x16xf32> -> vector<64x16xf32>
    %76 = arith.addf %69, %75 : vector<64x16xf32>
    %c0_73 = arith.constant 0 : index
    %c0_74 = arith.constant 0 : index
    %77 = vector.load %arg8[%c0_73, %c0_74] : memref<64x1xf32, #tpu.memory_space<vmem>>, vector<64x1xf32>
    %78 = vector.broadcast %77 : vector<64x1xf32> to vector<64x16xf32>
    %79 = arith.addf %76, %78 : vector<64x16xf32>
    %cst_75 = arith.constant 0.000000e+00 : f32
    %80 = vector.broadcast %cst_75 : f32 to vector<64x16xf32>
    %81 = arith.maximumf %79, %80 : vector<64x16xf32>
    %c0_76 = arith.constant 0 : index
    %c0_77 = arith.constant 0 : index
    %c0_78 = arith.constant 0 : index
    %82 = vector.load %arg12[%c0_76, %c0_77, %c0_78] : memref<4x16x32xf32, #tpu.memory_space<vmem>>, vector<1x16x32xf32>
    %83 = vector.shape_cast %82 : vector<1x16x32xf32> to vector<16x32xf32>
    %cst_79 = arith.constant dense<0.000000e+00> : vector<64x32xf32>
    %84 = tpu.matmul %81, %83, %cst_79 {dimension_numbers = #tpu.dot_dimension_numbers<[1], [0], [0], [1], [0, 0, 1, 1], [], []>} : vector<64x16xf32>, vector<16x32xf32>, vector<64x32xf32> -> vector<64x32xf32>
    %c0_80 = arith.constant 0 : index
    %c0_81 = arith.constant 0 : index
    %c0_82 = arith.constant 0 : index
    %85 = vector.load %arg10[%c0_80, %c0_81, %c0_82] : memref<4x32x64xf32, #tpu.memory_space<vmem>>, vector<1x32x64xf32>
    %86 = vector.shape_cast %85 : vector<1x32x64xf32> to vector<32x64xf32>
    %cst_83 = arith.constant dense<0.000000e+00> : vector<32x32xf32>
    %87 = tpu.matmul %86, %84, %cst_83 {dimension_numbers = #tpu.dot_dimension_numbers<[1], [0], [0], [1], [0, 0, 1, 1], [], []>} : vector<32x64xf32>, vector<64x32xf32>, vector<32x32xf32> -> vector<32x32xf32>
    %c1_84 = arith.constant 1 : index
    %c0_85 = arith.constant 0 : index
    %c0_86 = arith.constant 0 : index
    %88 = vector.load %arg12[%c1_84, %c0_85, %c0_86] : memref<4x16x32xf32, #tpu.memory_space<vmem>>, vector<1x16x32xf32>
    %89 = vector.shape_cast %88 : vector<1x16x32xf32> to vector<16x32xf32>
    %cst_87 = arith.constant dense<0.000000e+00> : vector<64x32xf32>
    %90 = tpu.matmul %81, %89, %cst_87 {dimension_numbers = #tpu.dot_dimension_numbers<[1], [0], [0], [1], [0, 0, 1, 1], [], []>} : vector<64x16xf32>, vector<16x32xf32>, vector<64x32xf32> -> vector<64x32xf32>
    %c1_88 = arith.constant 1 : index
    %c0_89 = arith.constant 0 : index
    %c0_90 = arith.constant 0 : index
    %91 = vector.load %arg10[%c1_88, %c0_89, %c0_90] : memref<4x32x64xf32, #tpu.memory_space<vmem>>, vector<1x32x64xf32>
    %92 = vector.shape_cast %91 : vector<1x32x64xf32> to vector<32x64xf32>
    %cst_91 = arith.constant dense<0.000000e+00> : vector<32x32xf32>
    %93 = tpu.matmul %92, %90, %cst_91 {dimension_numbers = #tpu.dot_dimension_numbers<[1], [0], [0], [1], [0, 0, 1, 1], [], []>} : vector<32x64xf32>, vector<64x32xf32>, vector<32x32xf32> -> vector<32x32xf32>
    %94 = arith.addf %87, %93 : vector<32x32xf32>
    %c2_92 = arith.constant 2 : index
    %c0_93 = arith.constant 0 : index
    %c0_94 = arith.constant 0 : index
    %95 = vector.load %arg12[%c2_92, %c0_93, %c0_94] : memref<4x16x32xf32, #tpu.memory_space<vmem>>, vector<1x16x32xf32>
    %96 = vector.shape_cast %95 : vector<1x16x32xf32> to vector<16x32xf32>
    %cst_95 = arith.constant dense<0.000000e+00> : vector<64x32xf32>
    %97 = tpu.matmul %81, %96, %cst_95 {dimension_numbers = #tpu.dot_dimension_numbers<[1], [0], [0], [1], [0, 0, 1, 1], [], []>} : vector<64x16xf32>, vector<16x32xf32>, vector<64x32xf32> -> vector<64x32xf32>
    %c2_96 = arith.constant 2 : index
    %c0_97 = arith.constant 0 : index
    %c0_98 = arith.constant 0 : index
    %98 = vector.load %arg10[%c2_96, %c0_97, %c0_98] : memref<4x32x64xf32, #tpu.memory_space<vmem>>, vector<1x32x64xf32>
    %99 = vector.shape_cast %98 : vector<1x32x64xf32> to vector<32x64xf32>
    %cst_99 = arith.constant dense<0.000000e+00> : vector<32x32xf32>
    %100 = tpu.matmul %99, %97, %cst_99 {dimension_numbers = #tpu.dot_dimension_numbers<[1], [0], [0], [1], [0, 0, 1, 1], [], []>} : vector<32x64xf32>, vector<64x32xf32>, vector<32x32xf32> -> vector<32x32xf32>
    %101 = arith.addf %94, %100 : vector<32x32xf32>
    %c3 = arith.constant 3 : index
    %c0_100 = arith.constant 0 : index
    %c0_101 = arith.constant 0 : index
    %102 = vector.load %arg12[%c3, %c0_100, %c0_101] : memref<4x16x32xf32, #tpu.memory_space<vmem>>, vector<1x16x32xf32>
    %103 = vector.shape_cast %102 : vector<1x16x32xf32> to vector<16x32xf32>
    %cst_102 = arith.constant dense<0.000000e+00> : vector<64x32xf32>
    %104 = tpu.matmul %81, %103, %cst_102 {dimension_numbers = #tpu.dot_dimension_numbers<[1], [0], [0], [1], [0, 0, 1, 1], [], []>} : vector<64x16xf32>, vector<16x32xf32>, vector<64x32xf32> -> vector<64x32xf32>
    %c3_103 = arith.constant 3 : index
    %c0_104 = arith.constant 0 : index
    %c0_105 = arith.constant 0 : index
    %105 = vector.load %arg10[%c3_103, %c0_104, %c0_105] : memref<4x32x64xf32, #tpu.memory_space<vmem>>, vector<1x32x64xf32>
    %106 = vector.shape_cast %105 : vector<1x32x64xf32> to vector<32x64xf32>
    %cst_106 = arith.constant dense<0.000000e+00> : vector<32x32xf32>
    %107 = tpu.matmul %106, %104, %cst_106 {dimension_numbers = #tpu.dot_dimension_numbers<[1], [0], [0], [1], [0, 0, 1, 1], [], []>} : vector<32x64xf32>, vector<64x32xf32>, vector<32x32xf32> -> vector<32x32xf32>
    %108 = arith.addf %101, %107 : vector<32x32xf32>
    %c0_107 = arith.constant 0 : index
    %c0_108 = arith.constant 0 : index
    %109 = vector.load %arg11[%c0_107, %c0_108] : memref<32x1xf32, #tpu.memory_space<vmem>>, vector<32x1xf32>
    %110 = vector.broadcast %109 : vector<32x1xf32> to vector<32x32xf32>
    %111 = arith.addf %108, %110 : vector<32x32xf32>
    %cst_109 = arith.constant 0.000000e+00 : f32
    %112 = vector.broadcast %cst_109 : f32 to vector<32x32xf32>
    %113 = arith.maximumf %111, %112 : vector<32x32xf32>
    %c0_110 = arith.constant 0 : index
    %c0_111 = arith.constant 0 : index
    %c0_112 = arith.constant 0 : index
    %114 = vector.load %arg15[%c0_110, %c0_111, %c0_112] : memref<4x32x64xf32, #tpu.memory_space<vmem>>, vector<1x32x64xf32>
    %115 = vector.shape_cast %114 : vector<1x32x64xf32> to vector<32x64xf32>
    %cst_113 = arith.constant dense<0.000000e+00> : vector<32x64xf32>
    %116 = tpu.matmul %113, %115, %cst_113 {dimension_numbers = #tpu.dot_dimension_numbers<[1], [0], [0], [1], [0, 0, 1, 1], [], []>} : vector<32x32xf32>, vector<32x64xf32>, vector<32x64xf32> -> vector<32x64xf32>
    %c0_114 = arith.constant 0 : index
    %c0_115 = arith.constant 0 : index
    %c0_116 = arith.constant 0 : index
    %117 = vector.load %arg13[%c0_114, %c0_115, %c0_116] : memref<4x16x32xf32, #tpu.memory_space<vmem>>, vector<1x16x32xf32>
    %118 = vector.shape_cast %117 : vector<1x16x32xf32> to vector<16x32xf32>
    %cst_117 = arith.constant dense<0.000000e+00> : vector<16x64xf32>
    %119 = tpu.matmul %118, %116, %cst_117 {dimension_numbers = #tpu.dot_dimension_numbers<[1], [0], [0], [1], [0, 0, 1, 1], [], []>} : vector<16x32xf32>, vector<32x64xf32>, vector<16x64xf32> -> vector<16x64xf32>
    %c1_118 = arith.constant 1 : index
    %c0_119 = arith.constant 0 : index
    %c0_120 = arith.constant 0 : index
    %120 = vector.load %arg15[%c1_118, %c0_119, %c0_120] : memref<4x32x64xf32, #tpu.memory_space<vmem>>, vector<1x32x64xf32>
    %121 = vector.shape_cast %120 : vector<1x32x64xf32> to vector<32x64xf32>
    %cst_121 = arith.constant dense<0.000000e+00> : vector<32x64xf32>
    %122 = tpu.matmul %113, %121, %cst_121 {dimension_numbers = #tpu.dot_dimension_numbers<[1], [0], [0], [1], [0, 0, 1, 1], [], []>} : vector<32x32xf32>, vector<32x64xf32>, vector<32x64xf32> -> vector<32x64xf32>
    %c1_122 = arith.constant 1 : index
    %c0_123 = arith.constant 0 : index
    %c0_124 = arith.constant 0 : index
    %123 = vector.load %arg13[%c1_122, %c0_123, %c0_124] : memref<4x16x32xf32, #tpu.memory_space<vmem>>, vector<1x16x32xf32>
    %124 = vector.shape_cast %123 : vector<1x16x32xf32> to vector<16x32xf32>
    %cst_125 = arith.constant dense<0.000000e+00> : vector<16x64xf32>
    %125 = tpu.matmul %124, %122, %cst_125 {dimension_numbers = #tpu.dot_dimension_numbers<[1], [0], [0], [1], [0, 0, 1, 1], [], []>} : vector<16x32xf32>, vector<32x64xf32>, vector<16x64xf32> -> vector<16x64xf32>
    %126 = arith.addf %119, %125 : vector<16x64xf32>
    %c2_126 = arith.constant 2 : index
    %c0_127 = arith.constant 0 : index
    %c0_128 = arith.constant 0 : index
    %127 = vector.load %arg15[%c2_126, %c0_127, %c0_128] : memref<4x32x64xf32, #tpu.memory_space<vmem>>, vector<1x32x64xf32>
    %128 = vector.shape_cast %127 : vector<1x32x64xf32> to vector<32x64xf32>
    %cst_129 = arith.constant dense<0.000000e+00> : vector<32x64xf32>
    %129 = tpu.matmul %113, %128, %cst_129 {dimension_numbers = #tpu.dot_dimension_numbers<[1], [0], [0], [1], [0, 0, 1, 1], [], []>} : vector<32x32xf32>, vector<32x64xf32>, vector<32x64xf32> -> vector<32x64xf32>
    %c2_130 = arith.constant 2 : index
    %c0_131 = arith.constant 0 : index
    %c0_132 = arith.constant 0 : index
    %130 = vector.load %arg13[%c2_130, %c0_131, %c0_132] : memref<4x16x32xf32, #tpu.memory_space<vmem>>, vector<1x16x32xf32>
    %131 = vector.shape_cast %130 : vector<1x16x32xf32> to vector<16x32xf32>
    %cst_133 = arith.constant dense<0.000000e+00> : vector<16x64xf32>
    %132 = tpu.matmul %131, %129, %cst_133 {dimension_numbers = #tpu.dot_dimension_numbers<[1], [0], [0], [1], [0, 0, 1, 1], [], []>} : vector<16x32xf32>, vector<32x64xf32>, vector<16x64xf32> -> vector<16x64xf32>
    %133 = arith.addf %126, %132 : vector<16x64xf32>
    %c3_134 = arith.constant 3 : index
    %c0_135 = arith.constant 0 : index
    %c0_136 = arith.constant 0 : index
    %134 = vector.load %arg15[%c3_134, %c0_135, %c0_136] : memref<4x32x64xf32, #tpu.memory_space<vmem>>, vector<1x32x64xf32>
    %135 = vector.shape_cast %134 : vector<1x32x64xf32> to vector<32x64xf32>
    %cst_137 = arith.constant dense<0.000000e+00> : vector<32x64xf32>
    %136 = tpu.matmul %113, %135, %cst_137 {dimension_numbers = #tpu.dot_dimension_numbers<[1], [0], [0], [1], [0, 0, 1, 1], [], []>} : vector<32x32xf32>, vector<32x64xf32>, vector<32x64xf32> -> vector<32x64xf32>
    %c3_138 = arith.constant 3 : index
    %c0_139 = arith.constant 0 : index
    %c0_140 = arith.constant 0 : index
    %137 = vector.load %arg13[%c3_138, %c0_139, %c0_140] : memref<4x16x32xf32, #tpu.memory_space<vmem>>, vector<1x16x32xf32>
    %138 = vector.shape_cast %137 : vector<1x16x32xf32> to vector<16x32xf32>
    %cst_141 = arith.constant dense<0.000000e+00> : vector<16x64xf32>
    %139 = tpu.matmul %138, %136, %cst_141 {dimension_numbers = #tpu.dot_dimension_numbers<[1], [0], [0], [1], [0, 0, 1, 1], [], []>} : vector<16x32xf32>, vector<32x64xf32>, vector<16x64xf32> -> vector<16x64xf32>
    %140 = arith.addf %133, %139 : vector<16x64xf32>
    %c0_142 = arith.constant 0 : index
    %c0_143 = arith.constant 0 : index
    %141 = vector.load %arg14[%c0_142, %c0_143] : memref<16x1xf32, #tpu.memory_space<vmem>>, vector<16x1xf32>
    %142 = vector.broadcast %141 : vector<16x1xf32> to vector<16x64xf32>
    %143 = arith.addf %140, %142 : vector<16x64xf32>
    %cst_144 = arith.constant 0.000000e+00 : f32
    %144 = vector.broadcast %cst_144 : f32 to vector<16x64xf32>
    %145 = arith.maximumf %143, %144 : vector<16x64xf32>
    %c0_145 = arith.constant 0 : index
    %c0_146 = arith.constant 0 : index
    %c0_147 = arith.constant 0 : index
    %146 = vector.load %arg18[%c0_145, %c0_146, %c0_147] : memref<4x64x128xf32, #tpu.memory_space<vmem>>, vector<1x64x128xf32>
    %147 = vector.shape_cast %146 : vector<1x64x128xf32> to vector<64x128xf32>
    %cst_148 = arith.constant dense<0.000000e+00> : vector<16x128xf32>
    %148 = tpu.matmul %145, %147, %cst_148 {dimension_numbers = #tpu.dot_dimension_numbers<[1], [0], [0], [1], [0, 0, 1, 1], [], []>} : vector<16x64xf32>, vector<64x128xf32>, vector<16x128xf32> -> vector<16x128xf32>
    %c0_149 = arith.constant 0 : index
    %c0_150 = arith.constant 0 : index
    %c0_151 = arith.constant 0 : index
    %149 = vector.load %arg16[%c0_149, %c0_150, %c0_151] : memref<4x1x16xf32, #tpu.memory_space<vmem>>, vector<1x1x16xf32>
    %150 = vector.shape_cast %149 : vector<1x1x16xf32> to vector<1x16xf32>
    %cst_152 = arith.constant dense<0.000000e+00> : vector<1x128xf32>
    %151 = tpu.matmul %150, %148, %cst_152 {dimension_numbers = #tpu.dot_dimension_numbers<[1], [0], [0], [1], [0, 0, 1, 1], [], []>} : vector<1x16xf32>, vector<16x128xf32>, vector<1x128xf32> -> vector<1x128xf32>
    %c1_153 = arith.constant 1 : index
    %c0_154 = arith.constant 0 : index
    %c0_155 = arith.constant 0 : index
    %152 = vector.load %arg18[%c1_153, %c0_154, %c0_155] : memref<4x64x128xf32, #tpu.memory_space<vmem>>, vector<1x64x128xf32>
    %153 = vector.shape_cast %152 : vector<1x64x128xf32> to vector<64x128xf32>
    %cst_156 = arith.constant dense<0.000000e+00> : vector<16x128xf32>
    %154 = tpu.matmul %145, %153, %cst_156 {dimension_numbers = #tpu.dot_dimension_numbers<[1], [0], [0], [1], [0, 0, 1, 1], [], []>} : vector<16x64xf32>, vector<64x128xf32>, vector<16x128xf32> -> vector<16x128xf32>
    %c1_157 = arith.constant 1 : index
    %c0_158 = arith.constant 0 : index
    %c0_159 = arith.constant 0 : index
    %155 = vector.load %arg16[%c1_157, %c0_158, %c0_159] : memref<4x1x16xf32, #tpu.memory_space<vmem>>, vector<1x1x16xf32>
    %156 = vector.shape_cast %155 : vector<1x1x16xf32> to vector<1x16xf32>
    %cst_160 = arith.constant dense<0.000000e+00> : vector<1x128xf32>
    %157 = tpu.matmul %156, %154, %cst_160 {dimension_numbers = #tpu.dot_dimension_numbers<[1], [0], [0], [1], [0, 0, 1, 1], [], []>} : vector<1x16xf32>, vector<16x128xf32>, vector<1x128xf32> -> vector<1x128xf32>
    %158 = arith.addf %151, %157 : vector<1x128xf32>
    %c2_161 = arith.constant 2 : index
    %c0_162 = arith.constant 0 : index
    %c0_163 = arith.constant 0 : index
    %159 = vector.load %arg18[%c2_161, %c0_162, %c0_163] : memref<4x64x128xf32, #tpu.memory_space<vmem>>, vector<1x64x128xf32>
    %160 = vector.shape_cast %159 : vector<1x64x128xf32> to vector<64x128xf32>
    %cst_164 = arith.constant dense<0.000000e+00> : vector<16x128xf32>
    %161 = tpu.matmul %145, %160, %cst_164 {dimension_numbers = #tpu.dot_dimension_numbers<[1], [0], [0], [1], [0, 0, 1, 1], [], []>} : vector<16x64xf32>, vector<64x128xf32>, vector<16x128xf32> -> vector<16x128xf32>
    %c2_165 = arith.constant 2 : index
    %c0_166 = arith.constant 0 : index
    %c0_167 = arith.constant 0 : index
    %162 = vector.load %arg16[%c2_165, %c0_166, %c0_167] : memref<4x1x16xf32, #tpu.memory_space<vmem>>, vector<1x1x16xf32>
    %163 = vector.shape_cast %162 : vector<1x1x16xf32> to vector<1x16xf32>
    %cst_168 = arith.constant dense<0.000000e+00> : vector<1x128xf32>
    %164 = tpu.matmul %163, %161, %cst_168 {dimension_numbers = #tpu.dot_dimension_numbers<[1], [0], [0], [1], [0, 0, 1, 1], [], []>} : vector<1x16xf32>, vector<16x128xf32>, vector<1x128xf32> -> vector<1x128xf32>
    %165 = arith.addf %158, %164 : vector<1x128xf32>
    %c3_169 = arith.constant 3 : index
    %c0_170 = arith.constant 0 : index
    %c0_171 = arith.constant 0 : index
    %166 = vector.load %arg18[%c3_169, %c0_170, %c0_171] : memref<4x64x128xf32, #tpu.memory_space<vmem>>, vector<1x64x128xf32>
    %167 = vector.shape_cast %166 : vector<1x64x128xf32> to vector<64x128xf32>
    %cst_172 = arith.constant dense<0.000000e+00> : vector<16x128xf32>
    %168 = tpu.matmul %145, %167, %cst_172 {dimension_numbers = #tpu.dot_dimension_numbers<[1], [0], [0], [1], [0, 0, 1, 1], [], []>} : vector<16x64xf32>, vector<64x128xf32>, vector<16x128xf32> -> vector<16x128xf32>
    %c3_173 = arith.constant 3 : index
    %c0_174 = arith.constant 0 : index
    %c0_175 = arith.constant 0 : index
    %169 = vector.load %arg16[%c3_173, %c0_174, %c0_175] : memref<4x1x16xf32, #tpu.memory_space<vmem>>, vector<1x1x16xf32>
    %170 = vector.shape_cast %169 : vector<1x1x16xf32> to vector<1x16xf32>
    %cst_176 = arith.constant dense<0.000000e+00> : vector<1x128xf32>
    %171 = tpu.matmul %170, %168, %cst_176 {dimension_numbers = #tpu.dot_dimension_numbers<[1], [0], [0], [1], [0, 0, 1, 1], [], []>} : vector<1x16xf32>, vector<16x128xf32>, vector<1x128xf32> -> vector<1x128xf32>
    %172 = arith.addf %165, %171 : vector<1x128xf32>
    %c0_177 = arith.constant 0 : index
    %c0_178 = arith.constant 0 : index
    %173 = vector.load %arg17[%c0_177, %c0_178] : memref<1x1xf32, #tpu.memory_space<vmem>>, vector<1x1xf32>
    %174 = vector.broadcast %173 : vector<1x1xf32> to vector<1x128xf32>
    %175 = arith.addf %172, %174 : vector<1x128xf32>
    %c0_179 = arith.constant 0 : index
    %c0_180 = arith.constant 0 : index
    %176 = vector.load %arg19[%c0_179, %c0_180] : memref<1x128xf32, #tpu.memory_space<vmem>>, vector<1x128xf32>
    tpu.vector_store %arg19[%c0_179, %c0_180], %175 {strides = array<i32>} : memref<1x128xf32, #tpu.memory_space<vmem>>, vector<1x128xf32>,
    return
  }
}

</mosaic_0001>

<bundles_post_ra>
// kernel: conv_autoencoder_forward.1
= control target key start
LH: loop header
LB: loop body
LE: loop exit
PB: predicated region body
PF: predicated region fallthrough
CT: control target
= control target key end

     0   :  { %s3099_s0 = inlined_call_operand.vmem [shape: f32[1,128], index: 0, kind: input, shape index: {}]   ;;  %s3100_s1 = inlined_call_operand.vmem [shape: f32[3,16,1], index: 1, kind: input, shape index: {}]   ;;  %s3101_s2 = inlined_call_operand.vmem [shape: f32[16,1], index: 2, kind: input, shape index: {}]   ;;  %s3102_s3 = inlined_call_operand.hbm [shape: f32[3,128,64], index: 3, kind: input, shape index: {}]   ;;  %s3103_s4 = inlined_call_operand.vmem [shape: f32[3,32,16], index: 4, kind: input, shape index: {}]   ;;  %s3104_s5 = inlined_call_operand.vmem [shape: f32[32,1], index: 5, kind: input, shape index: {}]   ;;  %s3105_s6 = inlined_call_operand.vmem [shape: f32[3,64,32], index: 6, kind: input, shape index: {}]   ;;  %s3106_s7 = inlined_call_operand.vmem [shape: f32[3,64,32], index: 7, kind: input, shape index: {}]   ;;  %s3107_s8 = inlined_call_operand.vmem [shape: f32[64,1], index: 8, kind: input, shape index: {}]   ;;  %s3108_s9 = inlined_call_operand.hbm [shape: f32[3,32,16], index: 9, kind: input, shape index: {}]   ;;  %s3109_s10 = inlined_call_operand.vmem [shape: f32[4,32,64], index: 10, kind: input, shape index: {}]   ;;  %s3110_s11 = inlined_call_operand.vmem [shape: f32[32,1], index: 11, kind: input, shape index: {}]   ;;  %s3111_s12 = inlined_call_operand.vmem [shape: f32[4,16,32], index: 12, kind: input, shape index: {}]   ;;  %s3112_s13 = inlined_call_operand.vmem [shape: f32[4,16,32], index: 13, kind: input, shape index: {}]   ;;  %s3113_s14 = inlined_call_operand.vmem [shape: f32[16,1], index: 14, kind: input, shape index: {}]   ;;  %s3114_s15 = inlined_call_operand.vmem [shape: f32[4,32,64], index: 15, kind: input, shape index: {}]   ;;  %s3115_s16 = inlined_call_operand.vmem [shape: f32[4,1,16], index: 16, kind: input, shape index: {}]   ;;  %s3116_s17 = inlined_call_operand.<no memory space> [shape: f32[1,1], index: 17, kind: input, shape index: {}]   ;;  %s3117_s18 = inlined_call_operand.vmem [shape: f32[4,64,128], index: 18, kind: input, shape index: {}]   ;;  %s3118_s19 = inlined_call_operand.vmem [shape: f32[1,128], index: 19, kind: output, shape index: {}]  }
   0x1   :  { %3121 = sst [smem:[#allocation9_spill]] %s3099_s0  ;;  %v24_v0 = vstv %s3116_s17 }
   0x2   :  { %3122 = sst [smem:[#allocation10_spill]] %s3100_s1  ;;  %25 = vst [vmem:[#allocation2] sm:$0x1] %v24_v0 }
   0x3   :  { %3123 = sst [smem:[#allocation11_spill]] %s3101_s2 }
   0x4   :  { %3124 = sst [smem:[#allocation12_spill]] %s3102_s3 }
   0x5   :  { %26 = vsyncpa [#allocation4], 0  ;;  %s3125_s1 = sld [smem:[#allocation12_spill]] }
   0xb   :  { %s38_s22 = sshll.u32 %s3125_s1, 4  ;;  %s39_s22 = int_to_ptr.hbm [resolvable:$true] %s38_s22 }
   0xc   :  { %27 = vsyncpa [#allocation6], 0  ;;  %s2235_s2 = smov [#allocation3]   ;;  %s61_s3 = sshll.u32 %s3108_s9, 4  ;;  %s62_s3 = int_to_ptr.hbm [resolvable:$true] %s61_s3 }
   0xd   :  { %s40_s23 = sshll.u32 %s2235_s2, 4  ;;  %s2236_s26 = smov 128   ;;  %s41_s23 = int_to_ptr.vmem [resolvable:$true] %s40_s23 }
   0xe   :  { %s2237_s27 = smov 8   ;;  %s2238_s17 = smov [#allocation5]  }
   0xf   :  { %46 = dma.hbm_to_vmem [thread:$0]  %s39_s22, 6144, %s41_s23, [#allocation4], %s2236_s26, %s2236_s26, %s2237_s27  }
  0x10   :  { %s63_s28 = sshll.u32 %s2238_s17, 4  ;;  %s64_s28 = int_to_ptr.vmem [resolvable:$true] %s63_s28 }
  0x11   :  { %69 = dma.hbm_to_vmem [thread:$0]  %s62_s3, 1536, %s64_s28, [#allocation6], %s2236_s26, %s2236_s26, %s2237_s27  }
  0x12   :  { %2231 = dma.done.wait [#allocation4], 6144  }
  0x13   :  { %2232 = vsyncadd [#allocation4], 4294961152 }
  0x14   :  { %2233 = dma.done.wait [#allocation6], 1536  }
  0x15   :  { %2234 = vsyncadd [#allocation6], 4294965760  ;;  %v2239_v1 = vmov 0   ;;  %s3126_s30 = sld [smem:[#allocation10_spill]]  ;;  %v164_v3 = vld [vmem:[#allocation3 + $0xf8] sm:$0xff]  ;;  %v111_v7 = vld [vmem:[#allocation3 + $0x70] sm:$0xff] }
  0x16   :  { %2181 = vset.pattern.permute.xlu1 %v2239_v1  ;;  %2180 = vset.pattern.permute.xlu0 %v2239_v1  ;;  %v219_v4 = vld [vmem:[#allocation3 + $0x178] sm:$0xff]  ;;  %v163_v8 = vld [vmem:[#allocation3 + $0xf0] sm:$0xff]  ;;  %v162_v10 = vld [vmem:[#allocation3 + $0xe8] sm:$0xff]  ;;  %s3127_s23 = sld [smem:[#allocation11_spill]]  ;;  %vm282_vm0 = vcmask 523264   ;;  %vm353_vm1 = vcmask 130048  }
  0x17   :  { %2182 = vset.pattern.permute.xlu2 %v2239_v1  ;;  %165 = vmatpush.msra.mxu1 %v164_v3  ;;  %v112_v6 = vld [vmem:[#allocation3 + $0x78] sm:$0xff]  ;;  %v218_v9 = vld [vmem:[#allocation3 + $0x170] sm:$0xff]  ;;  %v217_v11 = vld [vmem:[#allocation3 + $0x168] sm:$0xff]  ;;  %s3128_s25 = sld [smem:[#allocation9_spill]]  ;;  %vm554_vm2 = vcmask 261120  }
  0x18   :  { %220 = vmatpush.msra.mxu2 %v219_v4  ;;  %113 = vmatpush.msra.mxu0 %v112_v6  ;;  %v110_v12 = vld [vmem:[#allocation3 + $0x68] sm:$0xff]  ;;  %v161_v13 = vld [vmem:[#allocation3 + $0xe0] sm:$0xff]  ;;  %v160_v18 = vld [vmem:[#allocation3 + $0xd8] sm:$0xff] }
  0x19   :  { %166 = vmatpush.msra.mxu1 %v163_v8  ;;  %v216_v14 = vld [vmem:[#allocation3 + $0x160] sm:$0xff]  ;;  %v215_v19 = vld [vmem:[#allocation3 + $0x158] sm:$0xff]  ;;  %v159_v22 = vld [vmem:[#allocation3 + $0xd0] sm:$0xff] }
  0x1a   :  { %221 = vmatpush.msra.mxu2 %v218_v9  ;;  %114 = vmatpush.msra.mxu0 %v111_v7  ;;  %v109_v16 = vld [vmem:[#allocation3 + $0x60] sm:$0xff]  ;;  %v108_v21 = vld [vmem:[#allocation3 + $0x58] sm:$0xff]  ;;  %v214_v23 = vld [vmem:[#allocation3 + $0x150] sm:$0xff] }
  0x1b   :  { %v1924_v2 = vld [vmem:[%s3126_s30 + $0x20] sm:$0xff]  ;;  %167 = vmatpush.msra.mxu1 %v162_v10  ;;  %v134_v15 = vld [vmem:[%s3126_s30 + $0x8] sm:$0xff]  ;;  %v1922_v20 = vld [vmem:[%s3126_s30 + $0x10] sm:$0xff] }
  0x1c   :  { %245 = vperm.xlu1 %2181, %v1924_v2   ;;  %v133_v5 = vld [vmem:[%s3126_s30] sm:$0xff]  ;;  %222 = vmatpush.msra.mxu2 %v217_v11  ;;  %v107_v24 = vld [vmem:[#allocation3 + $0x50] sm:$0xff]  ;;  %v158_v25 = vld [vmem:[#allocation3 + $0xc8] sm:$0xff] }
  0x1d   :  { %137 = vperm.xlu0 %2180, %v133_v5   ;;  %v258_v17 = vld [vmem:[%s3127_s23] sm:$0xff]  ;;  %142 = vperm.xlu2 %2182, %v134_v15   ;;  %v213_v26 = vld [vmem:[#allocation3 + $0x148] sm:$0xff]  ;;  %v1923_v28 = vld [vmem:[%s3126_s30 + $0x18] sm:$0xff] }
  0x1e   :  { %115 = vmatpush.msra.mxu0 %v110_v12  ;;  %168 = vmatpush.msra.mxu1 %v161_v13  ;;  %v106_v27 = vld [vmem:[#allocation3 + $0x48] sm:$0xff]  ;;  %v157_v29 = vld [vmem:[#allocation3 + $0xc0] sm:$0xff]  ;;  %v156_v33 = vld [vmem:[#allocation3 + $0xb8] sm:$0xff] }
  0x1f   :  { %223 = vmatpush.msra.mxu2 %v216_v14  ;;  %v212_v30 = vld [vmem:[#allocation3 + $0x140] sm:$0xff]  ;;  %v211_v34 = vld [vmem:[#allocation3 + $0x138] sm:$0xff]  ;;  %v155_v37 = vld [vmem:[#allocation3 + $0xb0] sm:$0xff] }
  0x20   :  { %116 = vmatpush.msra.mxu0 %v109_v16  ;;  %169 = vmatpush.msra.mxu1 %v160_v18  ;;  %v105_v31 = vld [vmem:[#allocation3 + $0x40] sm:$0xff]  ;;  %v104_v36 = vld [vmem:[#allocation3 + $0x38] sm:$0xff]  ;;  %v210_v38 = vld [vmem:[#allocation3 + $0x130] sm:$0xff] }
  0x21   :  { %224 = vmatpush.msra.mxu2 %v215_v19  ;;  %v259_v32 = vld [vmem:[%s3127_s23 + $0x8] sm:$0xff]  ;;  %v103_v39 = vld [vmem:[#allocation3 + $0x30] sm:$0xff]  ;;  %v518_v43 = vld [vmem:[%s3104_s5] sm:$0xff] }
  0x22   :  { %117 = vmatpush.msra.mxu0 %v108_v21  ;;  %170 = vmatpush.msra.mxu1 %v159_v22  ;;  %v1925_v35 = vld [vmem:[%s3126_s30 + $0x28] sm:$0xff]  ;;  %v520_v47 = vld [vmem:[%s3104_s5 + $0x10] sm:$0xff]  ;;  %v152_v48 = vld [vmem:[#allocation3 + $0x98] sm:$0xff] }
  0x23   :  { %225 = vmatpush.msra.mxu2 %v214_v23  ;;  %v154_v40 = vld [vmem:[#allocation3 + $0xa8] sm:$0xff]  ;;  %v153_v44 = vld [vmem:[#allocation3 + $0xa0] sm:$0xff]  ;;  %v207_v49 = vld [vmem:[#allocation3 + $0x118] sm:$0xff] }
  0x24   :  { %262 = vperm.xlu1 %2181, %v258_v17   ;;  %118 = vmatpush.msra.mxu0 %v107_v24  ;;  %v209_v41 = vld [vmem:[#allocation3 + $0x128] sm:$0xff]  ;;  %v208_v45 = vld [vmem:[#allocation3 + $0x120] sm:$0xff]  ;;  %v100_v51 = vld [vmem:[#allocation3 + $0x18] sm:$0xff] }
  0x25   :  { %190 = vperm.xlu0 %2180, %v1922_v20   ;;  %171 = vmatpush.msra.mxu1 %v158_v25  ;;  %v102_v42 = vld [vmem:[#allocation3 + $0x28] sm:$0xff]  ;;  %v101_v46 = vld [vmem:[#allocation3 + $0x20] sm:$0xff]  ;;  %v151_v52 = vld [vmem:[#allocation3 + $0x90] sm:$0xff] }
  0x26   :  { %226 = vmatpush.msra.mxu2 %v213_v26  ;;  %119 = vmatpush.msra.mxu0 %v106_v27  ;;  %v519_v50 = vld [vmem:[%s3104_s5 + $0x8] sm:$0xff]  ;;  %v206_v53 = vld [vmem:[#allocation3 + $0x110] sm:$0xff]  ;;  %v96_v62 = vld [vmem:[%s3128_s25] sm:$0x1] }
  0x27   :  { %195 = vperm.xlu2 %2182, %v1923_v28   ;;  %172 = vmatpush.msra.mxu1 %v157_v29  ;;  %v99_v54 = vld [vmem:[#allocation3 + $0x10] sm:$0xff]  ;;  %v150_v55 = vld [vmem:[#allocation3 + $0x88] sm:$0xff]  ;;  %v149_v59 = vld [vmem:[#allocation3 + $0x80] sm:$0xff] }
  0x28   :  { %227 = vmatpush.msra.mxu2 %v212_v30  ;;  %120 = vmatpush.msra.mxu0 %v105_v31  ;;  %v205_v56 = vld [vmem:[#allocation3 + $0x108] sm:$0xff]  ;;  %v521_v58 = vld [vmem:[%s3104_s5 + $0x18] sm:$0xff]  ;;  %v204_v60 = vld [vmem:[#allocation3 + $0x100] sm:$0xff] }
  0x29   :  { %173 = vmatpush.msra.mxu1 %v156_v33  ;;  %v98_v57 = vld [vmem:[#allocation3 + $0x8] sm:$0xff]  ;;  %v97_v61 = vld [vmem:[#allocation3] sm:$0xff]  ;;  %v896_v3 = vld [vmem:[%s3107_s8 + $0x18] sm:$0xff] }
  0x2a   :  { %228 = vmatpush.msra.mxu2 %v211_v34  ;;  %121 = vmatpush.msra.mxu0 %v104_v36  ;;  %v894_v63 = vld [vmem:[%s3107_s8 + $0x8] sm:$0xff]  ;;  %v893_v0 = vld [vmem:[%s3107_s8] sm:$0xff]  ;;  %v895_v1 = vld [vmem:[%s3107_s8 + $0x10] sm:$0xff] }
  0x2b   :  { %174 = vmatpush.msra.mxu1 %v155_v37  ;;  %v897_v2 = vld [vmem:[%s3107_s8 + $0x20] sm:$0xff]  ;;  %v898_v4 = vld [vmem:[%s3107_s8 + $0x28] sm:$0xff]  ;;  %v900_v5 = vld [vmem:[%s3107_s8 + $0x38] sm:$0xff] }
  0x2c   :  { %267 = vperm.xlu1 %2181, %v259_v32   ;;  %229 = vmatpush.msra.mxu2 %v210_v38  ;;  %v899_v6 = vld [vmem:[%s3107_s8 + $0x30] sm:$0xff]  ;;  %v1347_v7 = vld [vmem:[%s3110_s11] sm:$0xff]  ;;  %v1348_v9 = vld [vmem:[%s3110_s11 + $0x8] sm:$0xff] }
  0x2d   :  { %250 = vperm.xlu0 %2180, %v1925_v35   ;;  %122 = vmatpush.msra.mxu0 %v103_v39  ;;  %v1349_v8 = vld [vmem:[%s3110_s11 + $0x10] sm:$0xff]  ;;  %v1350_v10 = vld [vmem:[%s3110_s11 + $0x18] sm:$0xff]  ;;  %v1658_v11 = vld [vmem:[%s3113_s14 + $0x8] sm:$0xff] }
  0x2e   :  { %175 = vmatpush.msra.mxu1 %v154_v40  ;;  %230 = vmatpush.msra.mxu2 %v209_v41  ;;  %v1657_v12 = vld [vmem:[%s3113_s14] sm:$0xff]  ;;  %v281_v14 = vld [vmem:[%s3105_s6 + $0x38] sm:$0xff]  ;;  %v280_v16 = vld [vmem:[%s3105_s6 + $0x30] sm:$0xff] }
  0x2f   :  { %123 = vmatpush.msra.mxu0 %v102_v42  ;;  %524 = vperm.xlu2 %2182, %v518_v43   ;;  %v1907_v13 = vld [vmem:[#allocation2] sm:$0x1]  ;;  %v2436_v15 = vld [vmem:[%s3105_s6 + $0xb8] sm:$0xff]  ;;  %v2445_v17 = vld [vmem:[%s3105_s6 + $0xb0] sm:$0xff] }
  0x30   :  { %176 = vmatpush.msra.mxu1 %v153_v44  ;;  %231 = vmatpush.msra.mxu2 %v208_v45  ;;  %v279_v18 = vld [vmem:[%s3105_s6 + $0x28] sm:$0xff]  ;;  %v278_v20 = vld [vmem:[%s3105_s6 + $0x20] sm:$0xff]  ;;  %v277_v22 = vld [vmem:[%s3105_s6 + $0x18] sm:$0xff] }
  0x31   :  { %124 = vmatpush.msra.mxu0 %v101_v46  ;;  %297 = vmatpush.msra.mxu3 %v281_v14  ;;  %v2454_v19 = vld [vmem:[%s3105_s6 + $0xa8] sm:$0xff]  ;;  %v2463_v21 = vld [vmem:[%s3105_s6 + $0xa0] sm:$0xff]  ;;  %v2472_v23 = vld [vmem:[%s3105_s6 + $0x98] sm:$0xff] }
  0x32   :  { %177 = vmatpush.msra.mxu1 %v152_v48  ;;  %232 = vmatpush.msra.mxu2 %v207_v49  ;;  %v276_v24 = vld [vmem:[%s3105_s6 + $0x10] sm:$0xff]  ;;  %v275_v26 = vld [vmem:[%s3105_s6 + $0x8] sm:$0xff]  ;;  %v274_v28 = vld [vmem:[%s3105_s6] sm:$0xff] }
  0x33   :  { %125 = vmatpush.msra.mxu0 %v100_v51  ;;  %298 = vmatpush.msra.mxu3 %v280_v16  ;;  %v2481_v25 = vld [vmem:[%s3105_s6 + $0x90] sm:$0xff]  ;;  %v1951_v27 = vld [vmem:[%s3105_s6 + $0x88] sm:$0xff]  ;;  %v1950_v29 = vld [vmem:[%s3105_s6 + $0x80] sm:$0xff] }
  0x34   :  { %534 = vperm.xlu1 %2181, %v520_v47   ;;  %178 = vmatpush.msra.mxu1 %v151_v52  ;;  %v1935_v30 = vld [vmem:[%s3105_s6 + $0x78] sm:$0xff]  ;;  %v1934_v31 = vld [vmem:[%s3105_s6 + $0x70] sm:$0xff]  ;;  %v1933_v32 = vld [vmem:[%s3105_s6 + $0x68] sm:$0xff] }
  0x35   :  { %529 = vperm.xlu0 %2180, %v519_v50   ;;  %233 = vmatpush.msra.mxu2 %v206_v53  ;;  %v1932_v33 = vld [vmem:[%s3105_s6 + $0x60] sm:$0xff]  ;;  %v1931_v35 = vld [vmem:[%s3105_s6 + $0x58] sm:$0xff]  ;;  %v1930_v36 = vld [vmem:[%s3105_s6 + $0x50] sm:$0xff] }
  0x36   :  { %126 = vmatpush.msra.mxu0 %v99_v54  ;;  %179 = vmatpush.msra.mxu1 %v150_v55  ;;  %v1929_v37 = vld [vmem:[%s3105_s6 + $0x48] sm:$0xff]  ;;  %v1928_v39 = vld [vmem:[%s3105_s6 + $0x40] sm:$0xff]  ;;  %v315_v14 = vld [vmem:[%s3103_s4 + $0x18] sm:$0xff] }
  0x37   :  { %234 = vmatpush.msra.mxu2 %v205_v56  ;;  %539 = vperm.xlu2 %2182, %v521_v58   ;;  %v1940_v16 = vld [vmem:[%s3103_s4 + $0x30] sm:$0xff] }
  0x38   :  { %127 = vmatpush.msra.mxu0 %v98_v57  ;;  %180 = vmatpush.msra.mxu1 %v149_v59 }
  0x39   :  { %235 = vmatpush.msra.mxu2 %v204_v60  ;;  %181 = vmatmul.f32.vlgmr.msra.gmra.mxu1 %v96_v62 }
  0x3a   :  { %128 = vmatpush.msra.mxu0 %v97_v61  ;;  %236 = vmatmul.f32.vlgmr.msra.gmra.mxu2 %v96_v62 }
  0x3b   :  { %129 = vmatmul.f32.vlgmr.msra.gmra.mxu0 %v96_v62  ;;  %453 = vmatpush.msrb.mxu2 %v2436_v15 }
  0x3c   :  { %908 = vperm.xlu1 %2181, %v894_v63   ;;  %299 = vmatpush.msra.mxu3 %v279_v18  ;;  %v1941_v18 = vld [vmem:[%s3103_s4 + $0x38] sm:$0xff] }
  0x3d   :  { %903 = vperm.xlu0 %2180, %v893_v0   ;;  %454 = vmatpush.msrb.mxu2 %v2445_v17 }
  0x3e   :  { %300 = vmatpush.msra.mxu3 %v278_v20  ;;  %v553_v20 = vld [vmem:[#allocation5 + $0x18] sm:$0xff] }
  0x3f   :  { %913 = vperm.xlu2 %2182, %v895_v1   ;;  %455 = vmatpush.msrb.mxu2 %v2454_v19 }
  0x40   :  { %301 = vmatpush.msra.mxu3 %v277_v22  ;;  %v552_v22 = vld [vmem:[#allocation5 + $0x10] sm:$0xff] }
  0x41   :  { %456 = vmatpush.msrb.mxu2 %v2463_v21 }
  0x42   :  { %302 = vmatpush.msra.mxu3 %v276_v24  ;;  %v551_v24 = vld [vmem:[#allocation5 + $0x8] sm:$0xff] }
  0x43   :  { %457 = vmatpush.msrb.mxu2 %v2472_v23 }
  0x44   :  { %923 = vperm.xlu1 %2181, %v897_v2   ;;  %303 = vmatpush.msra.mxu3 %v275_v26  ;;  %v550_v26 = vld [vmem:[#allocation5] sm:$0xff] }
  0x45   :  { %918 = vperm.xlu0 %2180, %v896_v3   ;;  %458 = vmatpush.msrb.mxu2 %v2481_v25 }
  0x46   :  { %304 = vmatpush.msra.mxu3 %v274_v28 }
  0x47   :  { %928 = vperm.xlu2 %2182, %v898_v4   ;;  %459 = vmatpush.msrb.mxu2 %v1951_v27  ;;  %v312_v4 = vld [vmem:[%s3103_s4] sm:$0xff] }
  0x48   :  { %333 = vmatpush.msrb.mxu3 %v1935_v30 }
  0x49   :  { %460 = vmatpush.msrb.mxu2 %v1950_v29 }
  0x4a   :  { %334 = vmatpush.msrb.mxu3 %v1934_v31 }
  0x4b   :  { %579 = vmatpush.msra.mxu2 %v553_v20  ;;  %v1980_v20 = vld [vmem:[%s3106_s7 + $0x60] sm:$0xff] }
  0x4c   :  { %938 = vperm.xlu1 %2181, %v900_v5   ;;  %335 = vmatpush.msrb.mxu3 %v1933_v32 }
  0x4d   :  { %933 = vperm.xlu0 %2180, %v899_v6   ;;  %v313_v6 = vld [vmem:[%s3103_s4 + $0x8] sm:$0xff]  ;;  %580 = vmatpush.msra.mxu2 %v552_v22  ;;  %v600_v22 = vld [vmem:[%s3106_s7 + $0x20] sm:$0xff] }
  0x4e   :  { %336 = vmatpush.msrb.mxu3 %v1932_v33  ;;  %v781_v33 = vld [vmem:[#allocation5 + $0x58] sm:$0xff] }
  0x4f   :  { %1353 = vperm.xlu2 %2182, %v1347_v7   ;;  %581 = vmatpush.msra.mxu2 %v551_v24  ;;  %v2005_v24 = vld [vmem:[%s3106_s7 + $0x88] sm:$0xff] }
  0x50   :  { %337 = vmatpush.msrb.mxu3 %v1931_v35 }
  0x51   :  { %582 = vmatpush.msra.mxu2 %v550_v26  ;;  %v1982_v26 = vld [vmem:[%s3106_s7 + $0x70] sm:$0xff] }
  0x52   :  { %338 = vmatpush.msrb.mxu3 %v1930_v36 }
  0x54   :  { %1363 = vperm.xlu1 %2181, %v1349_v8   ;;  %339 = vmatpush.msrb.mxu3 %v1929_v37  ;;  %v1938_v8 = vld [vmem:[%s3103_s4 + $0x20] sm:$0xff]  ;;  %v779_v37 = vld [vmem:[#allocation5 + $0x48] sm:$0xff] }
  0x55   :  { %1358 = vperm.xlu0 %2180, %v1348_v9   ;;  %v314_v9 = vld [vmem:[%s3103_s4 + $0x10] sm:$0xff] }
  0x56   :  { %340 = vmatpush.msrb.mxu3 %v1928_v39 }
  0x57   :  { %1368 = vperm.xlu2 %2182, %v1350_v10  }
  0x5c   :  { %1666 = vperm.xlu1 %2181, %v1658_v11   ;;  %v1960_v11 = vld [vmem:[%s3103_s4 + $0x40] sm:$0xff] }
  0x5d   :  { %1661 = vperm.xlu0 %2180, %v1657_v12   ;;  %v1939_v12 = vld [vmem:[%s3103_s4 + $0x28] sm:$0xff] }
  0x5f   :  { %1910 = vperm.xlu2 %2182, %v1907_v13  }
  0x77   :  { %v143_v38 = vpop.permute.xlu2 %142 }
  0x81   :  { %v196_v48 = vpop.permute.xlu2 %195 }
  0x8e   :  { %v246_v40 = vpop.permute.xlu1 %245 }
  0x8f   :  { %v138_v34 = vpop.permute.xlu0 %137 }
  0x96   :  { %v263_v53 = vpop.permute.xlu1 %262 }
  0x97   :  { %v191_v43 = vpop.permute.xlu0 %190 }
  0x9e   :  { %v268_v63 = vpop.permute.xlu1 %267 }
  0x9f   :  { %v251_v56 = vpop.permute.xlu0 %250 }
  0xb6   :  { %v182_v41 = vpop.f32.mrf.mxu1 }
  0xb7   :  { %v198_v45 = vperm.slane %v182_v41, 0 }
  0xb8   :  { %v130_v42 = vpop.f32.mrf.mxu0 }
  0xb9   :  { %v145_v44 = vperm.slane %v130_v42, 0  ;;  %v199_v47 = vmul.f32 %v198_v45, %v191_v43  ;;  %v200_v51 = vmul.f32 %v198_v45, %v196_v48 }
  0xbb   :  { %v146_v46 = vmul.f32 %v145_v44, %v138_v34  ;;  %v147_v50 = vmul.f32 %v145_v44, %v143_v38  ;;  %v780_v34 = vld [vmem:[#allocation5 + $0x50] sm:$0xff]  ;;  %v525_v38 = vpop.permute.xlu2 %524 }
  0xbd   :  { %v237_v49 = vpop.f32.mrf.mxu2  ;;  %v201_v54 = vadd.f32 %v199_v47, %v146_v46  ;;  %v202_v57 = vadd.f32 %v200_v51, %v147_v50  ;;  %v530_v47 = vpop.permute.xlu0 %529 }
  0xbe   :  { %v253_v52 = vperm.slane %v237_v49, 0 }
  0xc0   :  { %v254_v55 = vmul.f32 %v253_v52, %v246_v40  ;;  %v255_v58 = vmul.f32 %v253_v52, %v251_v56  ;;  %v778_v40 = vld [vmem:[#allocation5 + $0x40] sm:$0xff]  ;;  %v535_v52 = vpop.permute.xlu1 %534 }
  0xc2   :  { %v256_v59 = vadd.f32 %v254_v55, %v201_v54  ;;  %v257_v61 = vadd.f32 %v255_v58, %v202_v57 }
  0xc4   :  { %v270_v60 = vadd.f32 %v263_v53, %v256_v59  ;;  %v271_v0 = vadd.f32 %v268_v63, %v257_v61  ;;  %v540_v61 = vpop.permute.xlu2 %539 }
  0xc6   :  { %v272_v62 = vmax.f32 %v270_v60, 0.0  ;;  %v273_v1 = vmax.f32 %v271_v0, 0.0 }
  0xc8   :  { %1926 = vmatmul.msk.f32.vlgmr.msra.gmra.mxu3 %vm282_vm0, %v272_v62  ;;  %1958 = vmatmul.msk.f32.vlgmr.msrb.gmra.mxu2 %vm282_vm0, %v272_v62 }
  0xc9   :  { %2167 = vmatpush.msra.mxu3 %v2436_v15  ;;  %v1961_v15 = vld [vmem:[%s3103_s4 + $0x48] sm:$0xff]  ;;  %794 = vmatpush.msrb.mxu2 %v781_v33 }
  0xca   :  { %v2009_v33 = vld [vmem:[%s3106_s7 + $0xa8] sm:$0xff] }
  0xcb   :  { %2168 = vmatpush.msra.mxu3 %v2445_v17  ;;  %v1962_v17 = vld [vmem:[%s3103_s4 + $0x50] sm:$0xff]  ;;  %795 = vmatpush.msrb.mxu2 %v780_v34 }
  0xcc   :  { %v2010_v34 = vld [vmem:[%s3106_s7 + $0xb0] sm:$0xff] }
  0xcd   :  { %2169 = vmatpush.msra.mxu3 %v2454_v19  ;;  %v1963_v19 = vld [vmem:[%s3103_s4 + $0x58] sm:$0xff]  ;;  %796 = vmatpush.msrb.mxu2 %v779_v37  ;;  %v958_v37 = vld [vmem:[%s3111_s12 + $0x8] sm:$0xff] }
  0xcf   :  { %2170 = vmatpush.msra.mxu3 %v2463_v21  ;;  %v608_v21 = vld [vmem:[#allocation5 + $0x38] sm:$0xff]  ;;  %797 = vmatpush.msrb.mxu2 %v778_v40 }
  0xd0   :  { %1927 = vmatmul.msk.f32.gmra.mxu3 %vm282_vm0, %v273_v1 }
  0xd1   :  { %2171 = vmatpush.msra.mxu3 %v2472_v23  ;;  %v607_v23 = vld [vmem:[#allocation5 + $0x30] sm:$0xff] }
  0xd3   :  { %2172 = vmatpush.msra.mxu3 %v2481_v25  ;;  %v606_v25 = vld [vmem:[#allocation5 + $0x28] sm:$0xff] }
  0xd5   :  { %2173 = vmatpush.msra.mxu3 %v1951_v27  ;;  %v605_v27 = vld [vmem:[#allocation5 + $0x20] sm:$0xff] }
  0xd7   :  { %2174 = vmatpush.msra.mxu3 %v1950_v29 }
  0xd8   :  { %1936 = vmatmul.msk.f32.vlgmr.msrb.gmra.mxu3 %vm282_vm0, %v272_v62 }
  0xe0   :  { %1937 = vmatmul.msk.f32.gmra.mxu3 %vm282_vm0, %v273_v1 }
  0xe8   :  { %1959 = vmatmul.msk.f32.vlgmr.msra.gmra.mxu3 %vm282_vm0, %v273_v1 }
 0x14b   :  { %v306_v2 = vpop.f32.mrf.mxu3  ;;  %v462_v13 = vpop.f32.mrf.mxu2 }
 0x153   :  { %v309_v3 = vpop.f32.mrf.mxu3 }
 0x154   :  { %421 = vmatpush.msrb.mxu1 %v309_v3 }
 0x156   :  { %422 = vmatpush.msrb.mxu1 %v306_v2 }
 0x157   :  { %1946 = vmatmul.msk.f32.vlgmr.msrb.gmra.mxu1 %vm353_vm1, %v312_v4 }
 0x15b   :  { %v342_v5 = vpop.f32.mrf.mxu3 }
 0x15f   :  { %1947 = vmatmul.msk.f32.gmra.mxu1 %vm353_vm1, %v313_v6 }
 0x163   :  { %v345_v7 = vpop.f32.mrf.mxu3 }
 0x164   :  { %380 = vmatpush.msrb.mxu0 %v345_v7 }
 0x166   :  { %381 = vmatpush.msrb.mxu0 %v342_v5 }
 0x167   :  { %1942 = vmatmul.msk.f32.vlgmr.msrb.gmra.mxu0 %vm353_vm1, %v1938_v8  ;;  %1948 = vmatmul.msk.f32.gmra.mxu1 %vm353_vm1, %v314_v9  ;;  %v596_v8 = vld [vmem:[%s3106_s7] sm:$0xff] }
 0x168   :  { %621 = vmatpush.msra.mxu0 %v608_v21  ;;  %v1976_v9 = vld [vmem:[%s3106_s7 + $0x40] sm:$0xff] }
 0x169   :  { %v2004_v21 = vld [vmem:[%s3106_s7 + $0x80] sm:$0xff] }
 0x16a   :  { %622 = vmatpush.msra.mxu0 %v607_v23  ;;  %v1981_v23 = vld [vmem:[%s3106_s7 + $0x68] sm:$0xff] }
 0x16b   :  { %v465_v10 = vpop.f32.mrf.mxu3 }
 0x16c   :  { %499 = vmatpush.msrb.mxu3 %v465_v10  ;;  %623 = vmatpush.msra.mxu0 %v606_v25  ;;  %v601_v25 = vld [vmem:[%s3106_s7 + $0x28] sm:$0xff] }
 0x16e   :  { %500 = vmatpush.msrb.mxu3 %v462_v13  ;;  %624 = vmatpush.msra.mxu0 %v605_v27  ;;  %v2006_v27 = vld [vmem:[%s3106_s7 + $0x90] sm:$0xff] }
 0x16f   :  { %1964 = vmatmul.msk.f32.vlgmr.msrb.gmra.mxu3 %vm353_vm1, %v1960_v11  ;;  %1943 = vmatmul.msk.f32.gmra.mxu0 %vm353_vm1, %v1939_v12  ;;  %v1977_v11 = vld [vmem:[%s3106_s7 + $0x48] sm:$0xff] }
 0x170   :  { %1949 = vmatmul.msk.f32.gmra.mxu1 %vm353_vm1, %v315_v14  ;;  %v597_v12 = vld [vmem:[%s3106_s7 + $0x8] sm:$0xff]  ;;  %v1978_v14 = vld [vmem:[%s3106_s7 + $0x50] sm:$0xff] }
 0x177   :  { %1965 = vmatmul.msk.f32.gmra.mxu3 %vm353_vm1, %v1961_v15  ;;  %1944 = vmatmul.msk.f32.gmra.mxu0 %vm353_vm1, %v1940_v16  ;;  %v598_v15 = vld [vmem:[%s3106_s7 + $0x10] sm:$0xff] }
 0x17f   :  { %1966 = vmatmul.msk.f32.gmra.mxu3 %vm353_vm1, %v1962_v17  ;;  %1945 = vmatmul.msk.f32.gmra.mxu0 %vm353_vm1, %v1941_v18  ;;  %v1979_v17 = vld [vmem:[%s3106_s7 + $0x58] sm:$0xff] }
 0x180   :  { %v599_v18 = vld [vmem:[%s3106_s7 + $0x18] sm:$0xff] }
 0x187   :  { %1967 = vmatmul.msk.f32.gmra.mxu3 %vm353_vm1, %v1963_v19 }
 0x1d4   :  { %v424_v28 = vpop.f32.mrf.mxu1 }
 0x1dc   :  { %v427_v31 = vpop.f32.mrf.mxu1 }
 0x1e4   :  { %v383_v29 = vpop.f32.mrf.mxu0  ;;  %v430_v43 = vpop.f32.mrf.mxu1 }
 0x1e5   :  { %v425_v30 = vadd.f32 %v424_v28, %v383_v29  ;;  %v602_v28 = vld [vmem:[%s3106_s7 + $0x30] sm:$0xff]  ;;  %v1983_v29 = vld [vmem:[%s3106_s7 + $0x78] sm:$0xff] }
 0x1ec   :  { %v386_v32 = vpop.f32.mrf.mxu0 }
 0x1ed   :  { %v428_v42 = vadd.f32 %v427_v31, %v386_v32  ;;  %v433_v55 = vpop.f32.mrf.mxu1  ;;  %v603_v31 = vld [vmem:[%s3106_s7 + $0x38] sm:$0xff]  ;;  %v2008_v32 = vld [vmem:[%s3106_s7 + $0xa0] sm:$0xff] }
 0x1f2   :  { %v502_v35 = vpop.f32.mrf.mxu3 }
 0x1f3   :  { %v514_v36 = vadd.f32 %v502_v35, %v425_v30  ;;  %v2007_v30 = vld [vmem:[%s3106_s7 + $0x98] sm:$0xff] }
 0x1f4   :  { %v389_v45 = vpop.f32.mrf.mxu0  ;;  %v2011_v35 = vld [vmem:[%s3106_s7 + $0xb8] sm:$0xff] }
 0x1f5   :  { %v542_v39 = vadd.f32 %v525_v38, %v514_v36  ;;  %v431_v49 = vadd.f32 %v430_v43, %v389_v45  ;;  %v2029_v36 = vld [vmem:[%s3111_s12 + $0x18] sm:$0xff]  ;;  %v957_v38 = vld [vmem:[%s3111_s12] sm:$0xff] }
 0x1f7   :  { %v546_v41 = vmax.f32 %v542_v39, 0.0  ;;  %v2028_v39 = vld [vmem:[%s3111_s12 + $0x10] sm:$0xff] }
 0x1f9   :  { %1968 = vmatmul.msk.f32.vlgmr.msra.gmra.mxu2 %vm554_vm2, %v546_v41  ;;  %1972 = vmatmul.msk.f32.vlgmr.msra.gmra.mxu0 %vm554_vm2, %v546_v41 }
 0x1fa   :  { %v505_v44 = vpop.f32.mrf.mxu3  ;;  %997 = vmatpush.msra.mxu2 %v958_v37 }
 0x1fb   :  { %v515_v46 = vadd.f32 %v505_v44, %v428_v42 }
 0x1fc   :  { %v392_v54 = vpop.f32.mrf.mxu0  ;;  %998 = vmatpush.msra.mxu2 %v957_v38 }
 0x1fd   :  { %v543_v48 = vadd.f32 %v530_v47, %v515_v46  ;;  %v434_v57 = vadd.f32 %v433_v55, %v392_v54 }
 0x1ff   :  { %v547_v50 = vmax.f32 %v543_v48, 0.0 }
 0x201   :  { %1969 = vmatmul.msk.f32.gmra.mxu2 %vm554_vm2, %v547_v50  ;;  %1973 = vmatmul.msk.f32.gmra.mxu0 %vm554_vm2, %v547_v50 }
 0x202   :  { %v508_v51 = vpop.f32.mrf.mxu3 }
 0x203   :  { %v516_v53 = vadd.f32 %v508_v51, %v431_v49  ;;  %v904_v49 = vpop.permute.xlu0 %903 }
 0x205   :  { %v544_v56 = vadd.f32 %v535_v52, %v516_v53 }
 0x207   :  { %v548_v58 = vmax.f32 %v544_v56, 0.0  ;;  %v909_v56 = vpop.permute.xlu1 %908 }
 0x209   :  { %1970 = vmatmul.msk.f32.gmra.mxu2 %vm554_vm2, %v548_v58  ;;  %1974 = vmatmul.msk.f32.gmra.mxu0 %vm554_vm2, %v548_v58 }
 0x20a   :  { %v511_v59 = vpop.f32.mrf.mxu3 }
 0x20b   :  { %v517_v60 = vadd.f32 %v511_v59, %v434_v57 }
 0x20d   :  { %v545_v62 = vadd.f32 %v540_v61, %v517_v60 }
 0x20f   :  { %v549_v63 = vmax.f32 %v545_v62, 0.0 }
 0x211   :  { %1971 = vmatmul.msk.f32.gmra.mxu2 %vm554_vm2, %v549_v63  ;;  %1975 = vmatmul.msk.f32.gmra.mxu0 %vm554_vm2, %v549_v63 }
 0x219   :  { %2000 = vmatmul.msk.f32.vlgmr.msrb.gmra.mxu2 %vm554_vm2, %v546_v41 }
 0x221   :  { %2001 = vmatmul.msk.f32.gmra.mxu2 %vm554_vm2, %v547_v50 }
 0x229   :  { %2002 = vmatmul.msk.f32.gmra.mxu2 %vm554_vm2, %v548_v58 }
 0x231   :  { %2003 = vmatmul.msk.f32.gmra.mxu2 %vm554_vm2, %v549_v63  ;;  %v914_v63 = vpop.permute.xlu2 %913 }
 0x276   :  { %v626_v0 = vpop.f32.mrf.mxu0 }
 0x27c   :  { %v584_v1 = vpop.f32.mrf.mxu2 }
 0x27e   :  { %v629_v2 = vpop.f32.mrf.mxu0 }
 0x284   :  { %v587_v3 = vpop.f32.mrf.mxu2 }
 0x286   :  { %v632_v4 = vpop.f32.mrf.mxu0 }
 0x28c   :  { %v590_v5 = vpop.f32.mrf.mxu2 }
 0x28e   :  { %v635_v6 = vpop.f32.mrf.mxu0 }
 0x28f   :  { %683 = vmatpush.msra.mxu1 %v635_v6 }
 0x291   :  { %684 = vmatpush.msra.mxu1 %v632_v4 }
 0x293   :  { %685 = vmatpush.msra.mxu1 %v629_v2 }
 0x294   :  { %v593_v7 = vpop.f32.mrf.mxu2 }
 0x295   :  { %686 = vmatpush.msra.mxu1 %v626_v0  ;;  %748 = vmatpush.msra.mxu3 %v593_v7  ;;  %v919_v7 = vpop.permute.xlu0 %918 }
 0x296   :  { %1984 = vmatmul.msk.f32.vlgmr.msra.gmra.mxu1 %vm554_vm2, %v1976_v9 }
 0x297   :  { %749 = vmatpush.msra.mxu3 %v590_v5  ;;  %1045 = vmatpush.msrb.mxu1 %v2029_v36 }
 0x299   :  { %750 = vmatpush.msra.mxu3 %v587_v3  ;;  %1046 = vmatpush.msrb.mxu1 %v2028_v39 }
 0x29b   :  { %751 = vmatpush.msra.mxu3 %v584_v1 }
 0x29c   :  { %v799_v10 = vpop.f32.mrf.mxu2  ;;  %1992 = vmatmul.msk.f32.vlgmr.msra.gmra.mxu3 %vm554_vm2, %v596_v8 }
 0x29e   :  { %1985 = vmatmul.msk.f32.gmra.mxu1 %vm554_vm2, %v1977_v11 }
 0x2a4   :  { %v802_v13 = vpop.f32.mrf.mxu2  ;;  %1993 = vmatmul.msk.f32.gmra.mxu3 %vm554_vm2, %v597_v12 }
 0x2a6   :  { %1986 = vmatmul.msk.f32.gmra.mxu1 %vm554_vm2, %v1978_v14 }
 0x2ac   :  { %v805_v16 = vpop.f32.mrf.mxu2  ;;  %1994 = vmatmul.msk.f32.gmra.mxu3 %vm554_vm2, %v598_v15  ;;  %v924_v15 = vpop.permute.xlu1 %923 }
 0x2ae   :  { %1987 = vmatmul.msk.f32.gmra.mxu1 %vm554_vm2, %v1979_v17 }
 0x2b4   :  { %v808_v19 = vpop.f32.mrf.mxu2  ;;  %1995 = vmatmul.msk.f32.gmra.mxu3 %vm554_vm2, %v599_v18  ;;  %v939_v37 = vpop.permute.xlu1 %938 }
 0x2b5   :  { %856 = vmatpush.msrb.mxu0 %v808_v19 }
 0x2b6   :  { %1988 = vmatmul.msk.f32.gmra.mxu1 %vm554_vm2, %v1980_v20 }
 0x2b7   :  { %857 = vmatpush.msrb.mxu0 %v805_v16 }
 0x2b9   :  { %858 = vmatpush.msrb.mxu0 %v802_v13 }
 0x2bb   :  { %859 = vmatpush.msrb.mxu0 %v799_v10 }
 0x2bc   :  { %2012 = vmatmul.msk.f32.vlgmr.msrb.gmra.mxu0 %vm554_vm2, %v2004_v21  ;;  %1996 = vmatmul.msk.f32.gmra.mxu3 %vm554_vm2, %v600_v22 }
 0x2be   :  { %1989 = vmatmul.msk.f32.gmra.mxu1 %vm554_vm2, %v1981_v23  ;;  %v929_v23 = vpop.permute.xlu2 %928 }
 0x2c4   :  { %2013 = vmatmul.msk.f32.gmra.mxu0 %vm554_vm2, %v2005_v24  ;;  %1997 = vmatmul.msk.f32.gmra.mxu3 %vm554_vm2, %v601_v25 }
 0x2c6   :  { %1990 = vmatmul.msk.f32.gmra.mxu1 %vm554_vm2, %v1982_v26 }
 0x2cc   :  { %2014 = vmatmul.msk.f32.gmra.mxu0 %vm554_vm2, %v2006_v27  ;;  %1998 = vmatmul.msk.f32.gmra.mxu3 %vm554_vm2, %v602_v28  ;;  %v934_v28 = vpop.permute.xlu0 %933 }
 0x2ce   :  { %1991 = vmatmul.msk.f32.gmra.mxu1 %vm554_vm2, %v1983_v29 }
 0x2d4   :  { %2015 = vmatmul.msk.f32.gmra.mxu0 %vm554_vm2, %v2007_v30  ;;  %1999 = vmatmul.msk.f32.gmra.mxu3 %vm554_vm2, %v603_v31 }
 0x2dc   :  { %2016 = vmatmul.msk.f32.gmra.mxu0 %vm554_vm2, %v2008_v32 }
 0x2e4   :  { %2017 = vmatmul.msk.f32.gmra.mxu0 %vm554_vm2, %v2009_v33 }
 0x2ec   :  { %2018 = vmatmul.msk.f32.gmra.mxu0 %vm554_vm2, %v2010_v34 }
 0x2f4   :  { %2019 = vmatmul.msk.f32.gmra.mxu0 %vm554_vm2, %v2011_v35 }
 0x313   :  { %v688_v40 = vpop.f32.mrf.mxu1 }
 0x31b   :  { %v691_v42 = vpop.f32.mrf.mxu1 }
 0x31f   :  { %v753_v41 = vpop.f32.mrf.mxu3 }
 0x320   :  { %v754_v44 = vadd.f32 %v753_v41, %v688_v40 }
 0x323   :  { %v694_v45 = vpop.f32.mrf.mxu1 }
 0x327   :  { %v756_v43 = vpop.f32.mrf.mxu3 }
 0x328   :  { %v757_v52 = vadd.f32 %v756_v43, %v691_v42 }
 0x32b   :  { %v697_v55 = vpop.f32.mrf.mxu1 }
 0x32f   :  { %v759_v47 = vpop.f32.mrf.mxu3 }
 0x330   :  { %v760_v60 = vadd.f32 %v759_v47, %v694_v45 }
 0x333   :  { %v700_v1 = vpop.f32.mrf.mxu1 }
 0x337   :  { %v762_v57 = vpop.f32.mrf.mxu3 }
 0x338   :  { %v763_v4 = vadd.f32 %v762_v57, %v697_v55  ;;  %v2038_v57 = vld [vmem:[%s3109_s10 + $0x20] sm:$0xff] }
 0x339   :  { %v861_v46 = vpop.f32.mrf.mxu0 }
 0x33a   :  { %v885_v48 = vadd.f32 %v861_v46, %v754_v44 }
 0x33b   :  { %v703_v11 = vpop.f32.mrf.mxu1 }
 0x33c   :  { %v941_v50 = vadd.f32 %v904_v49, %v885_v48 }
 0x33e   :  { %v2700_v51 = vmax.f32 %v941_v50, 0.0 }
 0x33f   :  { %v765_v2 = vpop.f32.mrf.mxu3 }
 0x340   :  { %2020 = vmatmul.msk.f32.vlgmr.msra.gmra.mxu2 %vm353_vm1, %v2700_v51  ;;  %2030 = vmatmul.msk.f32.vlgmr.msrb.gmra.mxu1 %vm353_vm1, %v2700_v51  ;;  %v766_v10 = vadd.f32 %v765_v2, %v700_v1  ;;  %v1025_v1 = vld [vmem:[%s3109_s10 + $0x8] sm:$0xff]  ;;  %v2040_v2 = vld [vmem:[%s3109_s10 + $0x30] sm:$0xff] }
 0x341   :  { %v864_v53 = vpop.f32.mrf.mxu0 }
 0x342   :  { %v886_v54 = vadd.f32 %v864_v53, %v757_v52 }
 0x343   :  { %v706_v19 = vpop.f32.mrf.mxu1 }
 0x344   :  { %v942_v58 = vadd.f32 %v909_v56, %v886_v54 }
 0x346   :  { %v2706_v59 = vmax.f32 %v942_v58, 0.0  ;;  %v2051_v58 = vld [vmem:[%s3111_s12 + $0x28] sm:$0xff] }
 0x347   :  { %v768_v12 = vpop.f32.mrf.mxu3 }
 0x348   :  { %2021 = vmatmul.msk.f32.gmra.mxu2 %vm353_vm1, %v2706_v59  ;;  %2031 = vmatmul.msk.f32.gmra.mxu1 %vm353_vm1, %v2706_v59  ;;  %v769_v18 = vadd.f32 %v768_v12, %v703_v11 }
 0x349   :  { %v867_v61 = vpop.f32.mrf.mxu0 }
 0x34a   :  { %v887_v62 = vadd.f32 %v867_v61, %v760_v60  ;;  %v2050_v60 = vld [vmem:[%s3111_s12 + $0x20] sm:$0xff] }
 0x34b   :  { %v709_v30 = vpop.f32.mrf.mxu1  ;;  %v1024_v61 = vld [vmem:[%s3109_s10] sm:$0xff] }
 0x34c   :  { %v943_v0 = vadd.f32 %v914_v63, %v887_v62  ;;  %v2069_v62 = vld [vmem:[%s3111_s12 + $0x38] sm:$0xff]  ;;  %v2039_v63 = vld [vmem:[%s3109_s10 + $0x28] sm:$0xff] }
 0x34e   :  { %v2712_v3 = vmax.f32 %v943_v0, 0.0  ;;  %v2068_v0 = vld [vmem:[%s3111_s12 + $0x30] sm:$0xff] }
 0x34f   :  { %v771_v21 = vpop.f32.mrf.mxu3 }
 0x350   :  { %2022 = vmatmul.msk.f32.gmra.mxu2 %vm353_vm1, %v2712_v3  ;;  %2032 = vmatmul.msk.f32.gmra.mxu1 %vm353_vm1, %v2712_v3  ;;  %v772_v26 = vadd.f32 %v771_v21, %v706_v19 }
 0x351   :  { %v870_v5 = vpop.f32.mrf.mxu0 }
 0x352   :  { %v888_v6 = vadd.f32 %v870_v5, %v763_v4  ;;  %v1026_v4 = vld [vmem:[%s3109_s10 + $0x10] sm:$0xff]  ;;  %v2041_v5 = vld [vmem:[%s3109_s10 + $0x38] sm:$0xff] }
 0x354   :  { %v944_v8 = vadd.f32 %v919_v7, %v888_v6  ;;  %v1027_v6 = vld [vmem:[%s3109_s10 + $0x18] sm:$0xff] }
 0x356   :  { %v2718_v9 = vmax.f32 %v944_v8, 0.0 }
 0x357   :  { %v774_v31 = vpop.f32.mrf.mxu3 }
 0x358   :  { %2023 = vmatmul.msk.f32.gmra.mxu2 %vm353_vm1, %v2718_v9  ;;  %2033 = vmatmul.msk.f32.gmra.mxu1 %vm353_vm1, %v2718_v9  ;;  %v775_v34 = vadd.f32 %v774_v31, %v709_v30 }
 0x359   :  { %v873_v13 = vpop.f32.mrf.mxu0 }
 0x35a   :  { %v889_v14 = vadd.f32 %v873_v13, %v766_v10 }
 0x35c   :  { %v945_v16 = vadd.f32 %v924_v15, %v889_v14 }
 0x35e   :  { %v2724_v17 = vmax.f32 %v945_v16, 0.0 }
 0x360   :  { %2024 = vmatmul.msk.f32.gmra.mxu2 %vm353_vm1, %v2724_v17  ;;  %2034 = vmatmul.msk.f32.gmra.mxu1 %vm353_vm1, %v2724_v17 }
 0x361   :  { %v876_v20 = vpop.f32.mrf.mxu0 }
 0x362   :  { %v890_v22 = vadd.f32 %v876_v20, %v769_v18 }
 0x364   :  { %v946_v24 = vadd.f32 %v929_v23, %v890_v22 }
 0x366   :  { %v2730_v25 = vmax.f32 %v946_v24, 0.0 }
 0x368   :  { %2025 = vmatmul.msk.f32.gmra.mxu2 %vm353_vm1, %v2730_v25  ;;  %2035 = vmatmul.msk.f32.gmra.mxu1 %vm353_vm1, %v2730_v25 }
 0x369   :  { %v879_v27 = vpop.f32.mrf.mxu0 }
 0x36a   :  { %v891_v29 = vadd.f32 %v879_v27, %v772_v26 }
 0x36c   :  { %v947_v32 = vadd.f32 %v934_v28, %v891_v29 }
 0x36e   :  { %v2736_v33 = vmax.f32 %v947_v32, 0.0  ;;  %v2060_v32 = vld [vmem:[%s3109_s10 + $0x40] sm:$0xff] }
 0x370   :  { %2026 = vmatmul.msk.f32.gmra.mxu2 %vm353_vm1, %v2736_v33  ;;  %2036 = vmatmul.msk.f32.gmra.mxu1 %vm353_vm1, %v2736_v33 }
 0x371   :  { %v882_v35 = vpop.f32.mrf.mxu0 }
 0x372   :  { %v892_v36 = vadd.f32 %v882_v35, %v775_v34  ;;  %v2061_v34 = vld [vmem:[%s3109_s10 + $0x48] sm:$0xff] }
 0x373   :  { %v2079_v35 = vld [vmem:[%s3109_s10 + $0x68] sm:$0xff] }
 0x374   :  { %v948_v38 = vadd.f32 %v939_v37, %v892_v36  ;;  %v2062_v36 = vld [vmem:[%s3109_s10 + $0x50] sm:$0xff] }
 0x375   :  { %v2080_v37 = vld [vmem:[%s3109_s10 + $0x70] sm:$0xff] }
 0x376   :  { %v2742_v39 = vmax.f32 %v948_v38, 0.0  ;;  %v2063_v38 = vld [vmem:[%s3109_s10 + $0x58] sm:$0xff] }
 0x378   :  { %2027 = vmatmul.msk.f32.gmra.mxu2 %vm353_vm1, %v2742_v39  ;;  %2037 = vmatmul.msk.f32.gmra.mxu1 %vm353_vm1, %v2742_v39 }
 0x3bd   :  { %v1048_v40 = vpop.f32.mrf.mxu1 }
 0x3c3   :  { %v1000_v41 = vpop.f32.mrf.mxu2 }
 0x3c5   :  { %v1051_v42 = vpop.f32.mrf.mxu1 }
 0x3cb   :  { %v1003_v43 = vpop.f32.mrf.mxu2 }
 0x3cd   :  { %v1054_v44 = vpop.f32.mrf.mxu1 }
 0x3d3   :  { %v1006_v45 = vpop.f32.mrf.mxu2 }
 0x3d5   :  { %v1057_v46 = vpop.f32.mrf.mxu1 }
 0x3db   :  { %v1009_v47 = vpop.f32.mrf.mxu2 }
 0x3dd   :  { %v1060_v48 = vpop.f32.mrf.mxu1 }
 0x3e3   :  { %v1012_v49 = vpop.f32.mrf.mxu2 }
 0x3e5   :  { %v1063_v50 = vpop.f32.mrf.mxu1 }
 0x3eb   :  { %v1015_v52 = vpop.f32.mrf.mxu2 }
 0x3ed   :  { %v1066_v53 = vpop.f32.mrf.mxu1 }
 0x3f3   :  { %v1018_v54 = vpop.f32.mrf.mxu2 }
 0x3f5   :  { %v1069_v55 = vpop.f32.mrf.mxu1 }
 0x3f6   :  { %1097 = vmatpush.msrb.mxu3 %v1069_v55  ;;  %v2117_v55 = vld [vmem:[%s3114_s15 + $0x68] sm:$0xff] }
 0x3f8   :  { %1098 = vmatpush.msrb.mxu3 %v1066_v53  ;;  %v2118_v53 = vld [vmem:[%s3114_s15 + $0x70] sm:$0xff] }
 0x3fa   :  { %1099 = vmatpush.msrb.mxu3 %v1063_v50 }
 0x3fb   :  { %v1021_v56 = vpop.f32.mrf.mxu2 }
 0x3fc   :  { %1100 = vmatpush.msrb.mxu3 %v1060_v48  ;;  %1138 = vmatpush.msra.mxu0 %v1021_v56  ;;  %v1354_v56 = vpop.permute.xlu2 %1353 }
 0x3fe   :  { %1101 = vmatpush.msrb.mxu3 %v1057_v46  ;;  %1139 = vmatpush.msra.mxu0 %v1018_v54  ;;  %v1379_v46 = vld [vmem:[%s3114_s15] sm:$0xff] }
 0x400   :  { %1102 = vmatpush.msrb.mxu3 %v1054_v44  ;;  %1140 = vmatpush.msra.mxu0 %v1015_v52  ;;  %v1380_v44 = vld [vmem:[%s3114_s15 + $0x8] sm:$0xff]  ;;  %v2119_v52 = vld [vmem:[%s3114_s15 + $0x78] sm:$0xff] }
 0x402   :  { %1103 = vmatpush.msrb.mxu3 %v1051_v42  ;;  %1141 = vmatpush.msra.mxu0 %v1012_v49  ;;  %v1381_v42 = vld [vmem:[%s3114_s15 + $0x10] sm:$0xff] }
 0x404   :  { %1104 = vmatpush.msrb.mxu3 %v1048_v40  ;;  %1142 = vmatpush.msra.mxu0 %v1009_v47  ;;  %v1382_v40 = vld [vmem:[%s3114_s15 + $0x18] sm:$0xff]  ;;  %v2090_v47 = vld [vmem:[%s3114_s15 + $0x20] sm:$0xff] }
 0x405   :  { %2042 = vmatmul.msk.f32.vlgmr.msrb.gmra.mxu3 %vm282_vm0, %v2038_v57 }
 0x406   :  { %1143 = vmatpush.msra.mxu0 %v1006_v45  ;;  %1176 = vmatpush.msra.mxu3 %v2051_v58  ;;  %v2091_v45 = vld [vmem:[%s3114_s15 + $0x28] sm:$0xff] }
 0x408   :  { %1144 = vmatpush.msra.mxu0 %v1003_v43  ;;  %1177 = vmatpush.msra.mxu3 %v2050_v60  ;;  %v2092_v43 = vld [vmem:[%s3114_s15 + $0x30] sm:$0xff]  ;;  %v2116_v60 = vld [vmem:[%s3114_s15 + $0x60] sm:$0xff] }
 0x40a   :  { %1145 = vmatpush.msra.mxu0 %v1000_v41  ;;  %v2093_v41 = vld [vmem:[%s3114_s15 + $0x38] sm:$0xff] }
 0x40b   :  { %2046 = vmatmul.msk.f32.vlgmr.msra.gmra.mxu0 %vm282_vm0, %v1024_v61 }
 0x40c   :  { %1270 = vmatpush.msrb.mxu0 %v2069_v62 }
 0x40d   :  { %2043 = vmatmul.msk.f32.gmra.mxu3 %vm282_vm0, %v2039_v63 }
 0x40e   :  { %1271 = vmatpush.msrb.mxu0 %v2068_v0 }
 0x413   :  { %2047 = vmatmul.msk.f32.gmra.mxu0 %vm282_vm0, %v1025_v1  ;;  %v1359_v1 = vpop.permute.xlu0 %1358 }
 0x415   :  { %2044 = vmatmul.msk.f32.gmra.mxu3 %vm282_vm0, %v2040_v2 }
 0x41b   :  { %2048 = vmatmul.msk.f32.gmra.mxu0 %vm282_vm0, %v1026_v4 }
 0x41d   :  { %2045 = vmatmul.msk.f32.gmra.mxu3 %vm282_vm0, %v2041_v5 }
 0x423   :  { %2049 = vmatmul.msk.f32.gmra.mxu0 %vm282_vm0, %v1027_v6 }
 0x425   :  { %2052 = vmatmul.msk.f32.vlgmr.msra.gmra.mxu3 %vm353_vm1, %v2700_v51 }
 0x42b   :  { %2070 = vmatmul.msk.f32.vlgmr.msrb.gmra.mxu0 %vm353_vm1, %v2700_v51 }
 0x42d   :  { %2053 = vmatmul.msk.f32.gmra.mxu3 %vm353_vm1, %v2706_v59 }
 0x433   :  { %2071 = vmatmul.msk.f32.gmra.mxu0 %vm353_vm1, %v2706_v59 }
 0x435   :  { %2054 = vmatmul.msk.f32.gmra.mxu3 %vm353_vm1, %v2712_v3 }
 0x43b   :  { %2072 = vmatmul.msk.f32.gmra.mxu0 %vm353_vm1, %v2712_v3 }
 0x43d   :  { %2055 = vmatmul.msk.f32.gmra.mxu3 %vm353_vm1, %v2718_v9 }
 0x443   :  { %2073 = vmatmul.msk.f32.gmra.mxu0 %vm353_vm1, %v2718_v9 }
 0x445   :  { %2056 = vmatmul.msk.f32.gmra.mxu3 %vm353_vm1, %v2724_v17 }
 0x44b   :  { %2074 = vmatmul.msk.f32.gmra.mxu0 %vm353_vm1, %v2724_v17 }
 0x44d   :  { %2057 = vmatmul.msk.f32.gmra.mxu3 %vm353_vm1, %v2730_v25 }
 0x453   :  { %2075 = vmatmul.msk.f32.gmra.mxu0 %vm353_vm1, %v2730_v25 }
 0x455   :  { %2058 = vmatmul.msk.f32.gmra.mxu3 %vm353_vm1, %v2736_v33 }
 0x45b   :  { %2076 = vmatmul.msk.f32.gmra.mxu0 %vm353_vm1, %v2736_v33  ;;  %v2078_v33 = vld [vmem:[%s3109_s10 + $0x60] sm:$0xff] }
 0x45d   :  { %2059 = vmatmul.msk.f32.gmra.mxu3 %vm353_vm1, %v2742_v39 }
 0x463   :  { %2077 = vmatmul.msk.f32.gmra.mxu0 %vm353_vm1, %v2742_v39  ;;  %v2081_v39 = vld [vmem:[%s3109_s10 + $0x78] sm:$0xff] }
 0x488   :  { %v1106_v51 = vpop.f32.mrf.mxu3  ;;  %v1147_v59 = vpop.f32.mrf.mxu0 }
 0x489   :  { %v2824_v3 = vadd.f32 %v1147_v59, %v1106_v51 }
 0x490   :  { %v1109_v7 = vpop.f32.mrf.mxu3  ;;  %v1150_v8 = vpop.f32.mrf.mxu0 }
 0x491   :  { %v2826_v9 = vadd.f32 %v1150_v8, %v1109_v7 }
 0x498   :  { %v1112_v10 = vpop.f32.mrf.mxu3  ;;  %v1153_v11 = vpop.f32.mrf.mxu0 }
 0x499   :  { %v2828_v12 = vadd.f32 %v1153_v11, %v1112_v10 }
 0x4a0   :  { %v1115_v13 = vpop.f32.mrf.mxu3  ;;  %v1156_v14 = vpop.f32.mrf.mxu0 }
 0x4a1   :  { %v2830_v15 = vadd.f32 %v1156_v14, %v1115_v13  ;;  %v1369_v14 = vpop.permute.xlu2 %1368 }
 0x4a8   :  { %v1179_v16 = vpop.f32.mrf.mxu3  ;;  %v1273_v17 = vpop.f32.mrf.mxu0 }
 0x4b0   :  { %v1182_v18 = vpop.f32.mrf.mxu3  ;;  %v1276_v19 = vpop.f32.mrf.mxu0 }
 0x4b8   :  { %v1185_v20 = vpop.f32.mrf.mxu3  ;;  %v1279_v21 = vpop.f32.mrf.mxu0 }
 0x4c0   :  { %v1188_v22 = vpop.f32.mrf.mxu3  ;;  %v1282_v23 = vpop.f32.mrf.mxu0 }
 0x4c8   :  { %v1191_v24 = vpop.f32.mrf.mxu3  ;;  %v1285_v25 = vpop.f32.mrf.mxu0 }
 0x4d0   :  { %v1194_v26 = vpop.f32.mrf.mxu3  ;;  %v1288_v27 = vpop.f32.mrf.mxu0 }
 0x4d8   :  { %v1197_v28 = vpop.f32.mrf.mxu3  ;;  %v1291_v29 = vpop.f32.mrf.mxu0 }
 0x4e0   :  { %v1200_v30 = vpop.f32.mrf.mxu3  ;;  %v1294_v31 = vpop.f32.mrf.mxu0 }
 0x4e1   :  { %1228 = vmatpush.msrb.mxu2 %v1200_v30  ;;  %1322 = vmatpush.msra.mxu1 %v1294_v31  ;;  %v2104_v30 = vld [vmem:[%s3114_s15 + $0x40] sm:$0xff]  ;;  %v2099_v31 = vld [vmem:[%s3112_s13 + $0x18] sm:$0xff] }
 0x4e3   :  { %1229 = vmatpush.msrb.mxu2 %v1197_v28  ;;  %1323 = vmatpush.msra.mxu1 %v1291_v29  ;;  %v2105_v28 = vld [vmem:[%s3114_s15 + $0x48] sm:$0xff]  ;;  %v1424_v29 = vld [vmem:[%s3112_s13] sm:$0xff] }
 0x4e5   :  { %1230 = vmatpush.msrb.mxu2 %v1194_v26  ;;  %1324 = vmatpush.msra.mxu1 %v1288_v27  ;;  %v2106_v27 = vld [vmem:[%s3114_s15 + $0x50] sm:$0xff] }
 0x4e7   :  { %1231 = vmatpush.msrb.mxu2 %v1191_v24  ;;  %1325 = vmatpush.msra.mxu1 %v1285_v25  ;;  %v2107_v25 = vld [vmem:[%s3114_s15 + $0x58] sm:$0xff] }
 0x4e9   :  { %1232 = vmatpush.msrb.mxu2 %v1188_v22  ;;  %1326 = vmatpush.msra.mxu1 %v1282_v23  ;;  %v2098_v23 = vld [vmem:[%s3112_s13 + $0x10] sm:$0xff] }
 0x4eb   :  { %1233 = vmatpush.msrb.mxu2 %v1185_v20  ;;  %1327 = vmatpush.msra.mxu1 %v1279_v21 }
 0x4ed   :  { %1234 = vmatpush.msrb.mxu2 %v1182_v18  ;;  %1328 = vmatpush.msra.mxu1 %v1276_v19 }
 0x4ef   :  { %1235 = vmatpush.msrb.mxu2 %v1179_v16  ;;  %1329 = vmatpush.msra.mxu1 %v1273_v17 }
 0x4f0   :  { %2064 = vmatmul.msk.f32.vlgmr.msrb.gmra.mxu2 %vm282_vm0, %v2060_v32  ;;  %2082 = vmatmul.msk.f32.vlgmr.msra.gmra.mxu1 %vm282_vm0, %v2078_v33  ;;  %v1425_v33 = vld [vmem:[%s3112_s13 + $0x8] sm:$0xff] }
 0x4f1   :  { %1407 = vmatpush.msra.mxu2 %v1382_v40  ;;  %1443 = vmatpush.msrb.mxu1 %v2093_v41  ;;  %v2125_v40 = vld [vmem:[%s3112_s13 + $0x38] sm:$0xff] }
 0x4f3   :  { %1408 = vmatpush.msra.mxu2 %v1381_v42  ;;  %1444 = vmatpush.msrb.mxu1 %v2092_v43  ;;  %v2137_v42 = vld [vmem:[%s3117_s18 + $0x78] sm:$0xff] }
 0x4f4   :  { %v2150_v43 = vld [vmem:[%s3117_s18 + $0xb8] sm:$0xff] }
 0x4f5   :  { %1409 = vmatpush.msra.mxu2 %v1380_v44  ;;  %1445 = vmatpush.msrb.mxu1 %v2091_v45  ;;  %v2136_v44 = vld [vmem:[%s3117_s18 + $0x70] sm:$0xff] }
 0x4f6   :  { %v2149_v45 = vld [vmem:[%s3117_s18 + $0xb0] sm:$0xff] }
 0x4f7   :  { %1410 = vmatpush.msra.mxu2 %v1379_v46  ;;  %1446 = vmatpush.msrb.mxu1 %v2090_v47  ;;  %v2135_v46 = vld [vmem:[%s3117_s18 + $0x68] sm:$0xff] }
 0x4f8   :  { %2065 = vmatmul.msk.f32.gmra.mxu2 %vm282_vm0, %v2061_v34  ;;  %2083 = vmatmul.msk.f32.gmra.mxu1 %vm282_vm0, %v2079_v35  ;;  %v2148_v47 = vld [vmem:[%s3117_s18 + $0xa8] sm:$0xff] }
 0x4f9   :  { %1606 = vmatpush.msra.mxu1 %v2119_v52  ;;  %v1680_v52 = vld [vmem:[%s3117_s18 + $0x38] sm:$0xff] }
 0x4fb   :  { %1607 = vmatpush.msra.mxu1 %v2118_v53  ;;  %v1679_v53 = vld [vmem:[%s3117_s18 + $0x30] sm:$0xff] }
 0x4fd   :  { %1608 = vmatpush.msra.mxu1 %v2117_v55  ;;  %v2113_v55 = vld [vmem:[%s3112_s13 + $0x28] sm:$0xff] }
 0x4ff   :  { %1609 = vmatpush.msra.mxu1 %v2116_v60  ;;  %v1676_v60 = vld [vmem:[%s3117_s18 + $0x18] sm:$0xff] }
 0x500   :  { %2066 = vmatmul.msk.f32.gmra.mxu2 %vm282_vm0, %v2062_v36  ;;  %2084 = vmatmul.msk.f32.gmra.mxu1 %vm282_vm0, %v2080_v37 }
 0x508   :  { %2067 = vmatmul.msk.f32.gmra.mxu2 %vm282_vm0, %v2063_v38  ;;  %2085 = vmatmul.msk.f32.gmra.mxu1 %vm282_vm0, %v2081_v39  ;;  %v2124_v38 = vld [vmem:[%s3112_s13 + $0x30] sm:$0xff] }
 0x56d   :  { %v1331_v48 = vpop.f32.mrf.mxu1 }
 0x573   :  { %v1237_v49 = vpop.f32.mrf.mxu2 }
 0x574   :  { %v1249_v50 = vadd.f32 %v1237_v49, %v2824_v3  ;;  %v1364_v3 = vpop.permute.xlu1 %1363 }
 0x575   :  { %v1334_v57 = vpop.f32.mrf.mxu1 }
 0x576   :  { %v1343_v54 = vadd.f32 %v1331_v48, %v1249_v50  ;;  %v2112_v50 = vld [vmem:[%s3112_s13 + $0x20] sm:$0xff] }
 0x578   :  { %v1371_v58 = vadd.f32 %v1354_v56, %v1343_v54  ;;  %v1678_v54 = vld [vmem:[%s3117_s18 + $0x28] sm:$0xff]  ;;  %v1677_v56 = vld [vmem:[%s3117_s18 + $0x20] sm:$0xff] }
 0x57a   :  { %v2901_v61 = vmax.f32 %v1371_v58, 0.0  ;;  %v2147_v58 = vld [vmem:[%s3117_s18 + $0xa0] sm:$0xff] }
 0x57b   :  { %v1240_v62 = vpop.f32.mrf.mxu2 }
 0x57c   :  { %v1250_v63 = vadd.f32 %v1240_v62, %v2826_v9  ;;  %2086 = vmatmul.msk.f32.vlgmr.msra.gmra.mxu2 %vm554_vm2, %v2901_v61  ;;  %2094 = vmatmul.msk.f32.vlgmr.msrb.gmra.mxu1 %vm554_vm2, %v2901_v61  ;;  %v2146_v62 = vld [vmem:[%s3117_s18 + $0x98] sm:$0xff] }
 0x57d   :  { %v1337_v4 = vpop.f32.mrf.mxu1  ;;  %1808 = vmatpush.msrb.mxu1 %v2150_v43  ;;  %v2165_v43 = vld [vmem:[%s3115_s16 + $0x3] sm:$0x1] }
 0x57e   :  { %v1344_v0 = vadd.f32 %v1334_v57, %v1250_v63  ;;  %v2134_v57 = vld [vmem:[%s3117_s18 + $0x60] sm:$0xff]  ;;  %v1675_v63 = vld [vmem:[%s3117_s18 + $0x10] sm:$0xff] }
 0x57f   :  { %1809 = vmatpush.msrb.mxu1 %v2149_v45 }
 0x580   :  { %v1372_v2 = vadd.f32 %v1359_v1, %v1344_v0  ;;  %v2132_v0 = vld [vmem:[%s3117_s18 + $0x50] sm:$0xff] }
 0x581   :  { %1810 = vmatpush.msrb.mxu1 %v2148_v47  ;;  %v2145_v1 = vld [vmem:[%s3117_s18 + $0x90] sm:$0xff]  ;;  %v1911_v47 = vpop.permute.xlu2 %1910 }
 0x582   :  { %v1376_v5 = vmax.f32 %v1372_v2, 0.0  ;;  %v1674_v2 = vld [vmem:[%s3117_s18 + $0x8] sm:$0xff] }
 0x583   :  { %v1243_v6 = vpop.f32.mrf.mxu2  ;;  %1811 = vmatpush.msrb.mxu1 %v2147_v58 }
 0x584   :  { %v1251_v51 = vadd.f32 %v1243_v6, %v2828_v12  ;;  %2087 = vmatmul.msk.f32.gmra.mxu2 %vm554_vm2, %v1376_v5  ;;  %2095 = vmatmul.msk.f32.gmra.mxu1 %vm554_vm2, %v1376_v5  ;;  %v1673_v6 = vld [vmem:[%s3117_s18] sm:$0xff] }
 0x585   :  { %v1340_v10 = vpop.f32.mrf.mxu1  ;;  %1812 = vmatpush.msrb.mxu1 %v2146_v62 }
 0x586   :  { %v1345_v59 = vadd.f32 %v1337_v4, %v1251_v51  ;;  %v2131_v4 = vld [vmem:[%s3117_s18 + $0x48] sm:$0xff]  ;;  %v2130_v51 = vld [vmem:[%s3117_s18 + $0x40] sm:$0xff] }
 0x587   :  { %1813 = vmatpush.msrb.mxu1 %v2145_v1 }
 0x588   :  { %v1373_v7 = vadd.f32 %v1364_v3, %v1345_v59  ;;  %v2143_v59 = vld [vmem:[%s3117_s18 + $0x80] sm:$0xff]  ;;  %v2162_v3 = vld [vmem:[%s3117_s18 + $0xf8] sm:$0xff] }
 0x58a   :  { %v1377_v8 = vmax.f32 %v1373_v7, 0.0 }
 0x58b   :  { %v1246_v9 = vpop.f32.mrf.mxu2 }
 0x58c   :  { %v1252_v11 = vadd.f32 %v1246_v9, %v2830_v15  ;;  %2088 = vmatmul.msk.f32.gmra.mxu2 %vm554_vm2, %v1377_v8  ;;  %2096 = vmatmul.msk.f32.gmra.mxu1 %vm554_vm2, %v1377_v8  ;;  %v2160_v9 = vld [vmem:[%s3117_s18 + $0xe8] sm:$0xff] }
 0x58e   :  { %v1346_v13 = vadd.f32 %v1340_v10, %v1252_v11  ;;  %v2159_v10 = vld [vmem:[%s3117_s18 + $0xe0] sm:$0xff]  ;;  %v2158_v11 = vld [vmem:[%s3117_s18 + $0xd8] sm:$0xff] }
 0x590   :  { %v1374_v16 = vadd.f32 %v1369_v14, %v1346_v13  ;;  %v2157_v13 = vld [vmem:[%s3117_s18 + $0xd0] sm:$0xff]  ;;  %v2156_v14 = vld [vmem:[%s3117_s18 + $0xc8] sm:$0xff] }
 0x592   :  { %v1378_v12 = vmax.f32 %v1374_v16, 0.0 }
 0x594   :  { %2089 = vmatmul.msk.f32.gmra.mxu2 %vm554_vm2, %v1378_v12  ;;  %2097 = vmatmul.msk.f32.gmra.mxu1 %vm554_vm2, %v1378_v12 }
 0x59c   :  { %2120 = vmatmul.msk.f32.vlgmr.msra.gmra.mxu1 %vm554_vm2, %v2901_v61 }
 0x5a4   :  { %2121 = vmatmul.msk.f32.gmra.mxu1 %vm554_vm2, %v1376_v5 }
 0x5ac   :  { %2122 = vmatmul.msk.f32.gmra.mxu1 %vm554_vm2, %v1377_v8 }
 0x5b4   :  { %2123 = vmatmul.msk.f32.gmra.mxu1 %vm554_vm2, %v1378_v12 }
 0x5f9   :  { %v1448_v15 = vpop.f32.mrf.mxu1 }
 0x5ff   :  { %v1412_v17 = vpop.f32.mrf.mxu2 }
 0x601   :  { %v1451_v18 = vpop.f32.mrf.mxu1 }
 0x607   :  { %v1415_v19 = vpop.f32.mrf.mxu2 }
 0x609   :  { %v1454_v20 = vpop.f32.mrf.mxu1 }
 0x60f   :  { %v1418_v21 = vpop.f32.mrf.mxu2 }
 0x611   :  { %v1457_v22 = vpop.f32.mrf.mxu1 }
 0x612   :  { %1481 = vmatpush.msrb.mxu3 %v1457_v22 }
 0x614   :  { %1482 = vmatpush.msrb.mxu3 %v1454_v20 }
 0x616   :  { %1483 = vmatpush.msrb.mxu3 %v1451_v18 }
 0x617   :  { %v1421_v24 = vpop.f32.mrf.mxu2 }
 0x618   :  { %1484 = vmatpush.msrb.mxu3 %v1448_v15  ;;  %1510 = vmatpush.msrb.mxu2 %v1421_v24 }
 0x619   :  { %2100 = vmatmul.msk.f32.vlgmr.msrb.gmra.mxu3 %vm554_vm2, %v2098_v23  ;;  %v1611_v26 = vpop.f32.mrf.mxu1 }
 0x61a   :  { %1511 = vmatpush.msrb.mxu2 %v1418_v21  ;;  %1538 = vmatpush.msra.mxu3 %v2107_v25  ;;  %v1662_v21 = vpop.permute.xlu0 %1661 }
 0x61c   :  { %1512 = vmatpush.msrb.mxu2 %v1415_v19  ;;  %1539 = vmatpush.msra.mxu3 %v2106_v27 }
 0x61e   :  { %1513 = vmatpush.msrb.mxu2 %v1412_v17  ;;  %1540 = vmatpush.msra.mxu3 %v2105_v28 }
 0x61f   :  { %2102 = vmatmul.msk.f32.vlgmr.msrb.gmra.mxu2 %vm554_vm2, %v1424_v29  ;;  %v1667_v29 = vpop.permute.xlu1 %1666 }
 0x620   :  { %1541 = vmatpush.msra.mxu3 %v2104_v30 }
 0x621   :  { %2101 = vmatmul.msk.f32.gmra.mxu3 %vm554_vm2, %v2099_v31  ;;  %v1614_v32 = vpop.f32.mrf.mxu1 }
 0x627   :  { %2103 = vmatmul.msk.f32.gmra.mxu2 %vm554_vm2, %v1425_v33 }
 0x629   :  { %2108 = vmatmul.msk.f32.vlgmr.msra.gmra.mxu3 %vm554_vm2, %v2901_v61  ;;  %v1617_v34 = vpop.f32.mrf.mxu1  ;;  %v2133_v61 = vld [vmem:[%s3117_s18 + $0x58] sm:$0xff] }
 0x631   :  { %2109 = vmatmul.msk.f32.gmra.mxu3 %vm554_vm2, %v1376_v5  ;;  %v1620_v35 = vpop.f32.mrf.mxu1  ;;  %v2144_v5 = vld [vmem:[%s3117_s18 + $0x88] sm:$0xff] }
 0x632   :  { %1644 = vmatpush.msra.mxu2 %v1620_v35  ;;  %1814 = vmatpush.msrb.mxu1 %v2144_v5 }
 0x634   :  { %1645 = vmatpush.msra.mxu2 %v1617_v34  ;;  %1815 = vmatpush.msrb.mxu1 %v2143_v59 }
 0x636   :  { %1646 = vmatpush.msra.mxu2 %v1614_v32 }
 0x638   :  { %1647 = vmatpush.msra.mxu2 %v1611_v26 }
 0x639   :  { %2110 = vmatmul.msk.f32.gmra.mxu3 %vm554_vm2, %v1377_v8  ;;  %2126 = vmatmul.msk.f32.vlgmr.msra.gmra.mxu2 %vm554_vm2, %v2124_v38  ;;  %v2161_v8 = vld [vmem:[%s3117_s18 + $0xf0] sm:$0xff]  ;;  %v2140_v38 = vld [vmem:[%s3115_s16 + $0x1] sm:$0x1] }
 0x63a   :  { %1728 = vmatpush.msrb.mxu2 %v2137_v42 }
 0x63c   :  { %1729 = vmatpush.msrb.mxu2 %v2136_v44 }
 0x63e   :  { %1730 = vmatpush.msrb.mxu2 %v2135_v46 }
 0x640   :  { %1731 = vmatpush.msrb.mxu2 %v2134_v57 }
 0x641   :  { %2111 = vmatmul.msk.f32.gmra.mxu3 %vm554_vm2, %v1378_v12  ;;  %2127 = vmatmul.msk.f32.gmra.mxu2 %vm554_vm2, %v2125_v40  ;;  %v2155_v12 = vld [vmem:[%s3117_s18 + $0xc0] sm:$0xff] }
 0x642   :  { %1732 = vmatpush.msrb.mxu2 %v2133_v61 }
 0x644   :  { %1733 = vmatpush.msrb.mxu2 %v2132_v0 }
 0x646   :  { %1734 = vmatpush.msrb.mxu2 %v2131_v4 }
 0x648   :  { %1735 = vmatpush.msrb.mxu2 %v2130_v51 }
 0x64a   :  { %1866 = vmatpush.msra.mxu2 %v2162_v3 }
 0x64c   :  { %1867 = vmatpush.msra.mxu2 %v2161_v8 }
 0x64e   :  { %1868 = vmatpush.msra.mxu2 %v2160_v9 }
 0x650   :  { %1869 = vmatpush.msra.mxu2 %v2159_v10 }
 0x652   :  { %1870 = vmatpush.msra.mxu2 %v2158_v11 }
 0x654   :  { %1871 = vmatpush.msra.mxu2 %v2157_v13 }
 0x656   :  { %1872 = vmatpush.msra.mxu2 %v2156_v14 }
 0x658   :  { %1873 = vmatpush.msra.mxu2 %v2155_v12 }
 0x69c   :  { %v2954_v36 = vpop.f32.mrf.mxu3 }
 0x6a2   :  { %v1515_v7 = vpop.f32.mrf.mxu2 }
 0x6a3   :  { %v1516_v17 = vadd.f32 %v1515_v7, %v2954_v36  ;;  %v1710_v36 = vld [vmem:[%s3115_s16] sm:$0x1] }
 0x6a4   :  { %v2956_v37 = vpop.f32.mrf.mxu3 }
 0x6aa   :  { %v1518_v16 = vpop.f32.mrf.mxu2 }
 0x6ab   :  { %v1519_v23 = vadd.f32 %v1518_v16, %v2956_v37 }
 0x6ac   :  { %v1543_v39 = vpop.f32.mrf.mxu3 }
 0x6b4   :  { %v1546_v41 = vpop.f32.mrf.mxu3 }
 0x6bc   :  { %v1549_v48 = vpop.f32.mrf.mxu3  ;;  %v1649_v15 = vpop.f32.mrf.mxu2 }
 0x6c4   :  { %v1552_v49 = vpop.f32.mrf.mxu3  ;;  %v1652_v26 = vpop.f32.mrf.mxu2 }
 0x6c5   :  { %1576 = vmatpush.msra.mxu0 %v1552_v49 }
 0x6c7   :  { %1577 = vmatpush.msra.mxu0 %v1549_v48 }
 0x6c9   :  { %1578 = vmatpush.msra.mxu0 %v1546_v41  ;;  %v2153_v41 = vld [vmem:[%s3115_s16 + $0x2] sm:$0x1] }
 0x6cb   :  { %1579 = vmatpush.msra.mxu0 %v1543_v39 }
 0x6cc   :  { %2114 = vmatmul.msk.f32.vlgmr.msra.gmra.mxu0 %vm554_vm2, %v2112_v50 }
 0x6cd   :  { %1695 = vmatpush.msrb.mxu0 %v1680_v52  ;;  %v1913_v52 = vperm.slane %v1911_v47, 0 }
 0x6cf   :  { %1696 = vmatpush.msrb.mxu0 %v1679_v53 }
 0x6d1   :  { %1697 = vmatpush.msrb.mxu0 %v1678_v54 }
 0x6d3   :  { %1698 = vmatpush.msrb.mxu0 %v1677_v56 }
 0x6d4   :  { %2115 = vmatmul.msk.f32.gmra.mxu0 %vm554_vm2, %v2113_v55 }
 0x6d5   :  { %1699 = vmatpush.msrb.mxu0 %v1676_v60 }
 0x6d7   :  { %1700 = vmatpush.msrb.mxu0 %v1675_v63 }
 0x6d9   :  { %1701 = vmatpush.msrb.mxu0 %v1674_v2 }
 0x6db   :  { %1702 = vmatpush.msrb.mxu0 %v1673_v6 }
 0x749   :  { %v1581_v18 = vpop.f32.mrf.mxu0 }
 0x74a   :  { %v1587_v19 = vadd.f32 %v1581_v18, %v1516_v17 }
 0x74c   :  { %v1655_v20 = vadd.f32 %v1649_v15, %v1587_v19 }
 0x74e   :  { %v1669_v22 = vadd.f32 %v1662_v21, %v1655_v20 }
 0x750   :  { %v1671_v24 = vmax.f32 %v1669_v22, 0.0 }
 0x751   :  { %v1584_v25 = vpop.f32.mrf.mxu0 }
 0x752   :  { %v1588_v27 = vadd.f32 %v1584_v25, %v1519_v23  ;;  %2128 = vmatmul.msk.f32.vlgmr.msrb.gmra.mxu0 %vm282_vm0, %v1671_v24  ;;  %2138 = vmatmul.msk.f32.vlgmr.msrb.gmra.mxu2 %vm282_vm0, %v1671_v24 }
 0x753   :  { %2151 = vmatmul.msk.f32.vlgmr.msrb.gmra.mxu1 %vm282_vm0, %v1671_v24 }
 0x754   :  { %v1656_v28 = vadd.f32 %v1652_v26, %v1588_v27 }
 0x756   :  { %v1670_v30 = vadd.f32 %v1667_v29, %v1656_v28 }
 0x758   :  { %v1672_v31 = vmax.f32 %v1670_v30, 0.0 }
 0x75a   :  { %2129 = vmatmul.msk.f32.gmra.mxu0 %vm282_vm0, %v1672_v31  ;;  %2139 = vmatmul.msk.f32.gmra.mxu2 %vm282_vm0, %v1672_v31 }
 0x75b   :  { %2152 = vmatmul.msk.f32.gmra.mxu1 %vm282_vm0, %v1672_v31 }
 0x762   :  { %2163 = vmatmul.msk.f32.vlgmr.msra.gmra.mxu2 %vm282_vm0, %v1671_v24 }
 0x76a   :  { %2164 = vmatmul.msk.f32.gmra.mxu2 %vm282_vm0, %v1672_v31 }
 0x7cf   :  { %v1704_v32 = vpop.f32.mrf.mxu0 }
 0x7d0   :  { %v1817_v34 = vpop.f32.mrf.mxu1 }
 0x7d5   :  { %v1737_v33 = vpop.f32.mrf.mxu2 }
 0x7d7   :  { %v1707_v35 = vpop.f32.mrf.mxu0 }
 0x7d8   :  { %1785 = vmatpush.msra.mxu0 %v1707_v35  ;;  %v1820_v39 = vpop.f32.mrf.mxu1 }
 0x7da   :  { %1786 = vmatpush.msra.mxu0 %v1704_v32 }
 0x7db   :  { %2142 = vmatmul.msk.f32.vlgmr.msra.gmra.mxu0 %vm353_vm1, %v1710_v36 }
 0x7dd   :  { %v1740_v37 = vpop.f32.mrf.mxu2 }
 0x7de   :  { %1762 = vmatpush.msrb.mxu3 %v1740_v37 }
 0x7e0   :  { %1763 = vmatpush.msrb.mxu3 %v1737_v33 }
 0x7e1   :  { %2141 = vmatmul.msk.f32.vlgmr.msrb.gmra.mxu3 %vm353_vm1, %v2140_v38 }
 0x7e2   :  { %1842 = vmatpush.msra.mxu3 %v1820_v39 }
 0x7e4   :  { %1843 = vmatpush.msra.mxu3 %v1817_v34 }
 0x7e5   :  { %v1875_v40 = vpop.f32.mrf.mxu2 }
 0x7e9   :  { %2154 = vmatmul.msk.f32.vlgmr.msra.gmra.mxu3 %vm353_vm1, %v2153_v41 }
 0x7ed   :  { %v1878_v42 = vpop.f32.mrf.mxu2 }
 0x7ee   :  { %1900 = vmatpush.msrb.mxu0 %v1878_v42 }
 0x7f0   :  { %1901 = vmatpush.msrb.mxu0 %v1875_v40 }
 0x7f1   :  { %2166 = vmatmul.msk.f32.vlgmr.msrb.gmra.mxu0 %vm353_vm1, %v2165_v43 }
 0x858   :  { %v1788_v45 = vpop.f32.mrf.mxu0 }
 0x864   :  { %v1765_v44 = vpop.f32.mrf.mxu3 }
 0x865   :  { %v1789_v46 = vadd.f32 %v1788_v45, %v1765_v44 }
 0x86c   :  { %v1845_v48 = vpop.f32.mrf.mxu3 }
 0x86d   :  { %v1848_v49 = vadd.f32 %v1845_v48, %v1789_v46 }
 0x86e   :  { %v1903_v50 = vpop.f32.mrf.mxu0 }
 0x86f   :  { %v1906_v53 = vadd.f32 %v1903_v50, %v1848_v49 }
 0x871   :  { %v1914_v54 = vadd.f32 %v1913_v52, %v1906_v53 }
 0x873   :  { %1915 = vst [vmem:[%s3118_s19] sm:$0x1] %v1914_v54 }
 0x874   :  { %1920 = vsyncpa [#allocation4], 1 }
 0x875   :  { %1921 = vsyncpa [#allocation6], 1 }

</bundles_post_ra>
